<compile_context>
chip_gen: v7x
topology: tpu7x:2x2x1
jax: 0.10.0
libtpu: 0.0.40
codegen_flags: <defaults>
</compile_context>

<pallas_src>
import functools

import jax
import jax.numpy as jnp
import numpy as np
from jax.experimental import pallas as pl
from jax.experimental.pallas import tpu as pltpu


def _elu(x):
    # F.elu(alpha=1): x if x > 0 else exp(x) - 1  (clamped exp arg for safety)
    return jnp.where(x > 0, x, jnp.exp(jnp.minimum(x, 0.0)) - 1.0)


# --------------------------------------------------------------- fused kernel
def _fused_kernel(h_ref,      # (V, n, h2)   per-view input features
                  a_ref,      # (V, n, n)    per-view adjacency (dense)
                  wself_ref,  # (V, n, n)    per-view self-expression weight
                  sel_ref,    # (V, 2E, n)   one-hot gather rows: [S rows | R rows]
                  mask_ref,   # (n, n)       1 - eye(n)
                  wenc_ref,   # (h2, h3)     shared encoder GCN weight
                  wdec_ref,   # (h3, h2)     shared decoder GCN weight
                  coef_ref,   # out (V, n, n)
                  loss_ref,   # out (V, 1, 128): lanes [ft, SE, C_Reg, st, 0...]
                  *, n_edges):
    n_views = h_ref.shape[0]          # 1 (two-core grid) or 2 (merged single step)
    mask = mask_ref[...]
    wenc = wenc_ref[...]
    wdec = wdec_ref[...]
    lane = jax.lax.broadcasted_iota(jnp.int32, (1, 128), 1)

    for v in range(n_views):          # static unroll over views in this block
        h = h_ref[v]                  # eval-mode dropout == identity
        a = a_ref[v]

        # ---- encoder GCN: Z = elu(A @ (H @ W_enc)) -------------------------
        hw = jnp.dot(h, wenc, preferred_element_type=jnp.float32)
        z = _elu(jnp.dot(a, hw, preferred_element_type=jnp.float32))          # (n, h3)

        # ---- self-expression: coef = W * (1 - eye); ZC = coef @ Z ----------
        coef = wself_ref[v] * mask
        coef_ref[v] = coef
        zc = jnp.dot(coef, z, preferred_element_type=jnp.float32)             # (n, h3)

        # ---- decoder GCN: H_ = elu(A @ (ZC @ W_dec)) ------------------------
        zcw = jnp.dot(zc, wdec, preferred_element_type=jnp.float32)
        h_rec = _elu(jnp.dot(a, zcw, preferred_element_type=jnp.float32))     # (n, h2)

        # ---- per-view loss terms (all reductions in-kernel) -----------------
        mse_rec = jnp.mean((h - h_rec) ** 2)
        se = 0.5 * jnp.mean((z - zc) ** 2)
        creg = jnp.sum(jnp.abs(coef))

        # structure loss: sum_e softplus(-<Z[S_e], Z[R_e]>), gather via one
        # vectorized one-hot matmul (Z never leaves VMEM).
        emb = jnp.dot(sel_ref[v], z, preferred_element_type=jnp.float32)      # (2E, h3)
        x = jnp.sum(emb[:n_edges] * emb[n_edges:], axis=-1, keepdims=True)    # (E, 1)
        st = jnp.sum(jnp.maximum(-x, 0.0) + jnp.log(1.0 + jnp.exp(-jnp.abs(x))))

        # ---- lane-dense scalar writeback: one (1,128) row per view ----------
        loss_ref[v] = (jnp.where(lane == 0, mse_rec, 0.0)
                       + jnp.where(lane == 1, se, 0.0)
                       + jnp.where(lane == 2, creg, 0.0)
                       + jnp.where(lane == 3, st, 0.0))


# ---------------------------------------------------------- device adaptivity
def _views_per_grid_step():
    """1 -> grid=(2,) sharded over 2 TensorCores; 2 -> both views in one step."""
    try:
        kind = jax.devices()[0].device_kind.lower()
    except Exception:
        return 2
    # 2-TensorCore-per-device chips: keep the parallel view grid.
    if any(tag in kind for tag in ("v7", "v5p", "v4")):
        return 1
    # single-TC chips (v5e / v6e): merge both views into one grid step.
    return 2


# --------------------------------------------------------------- full forward
def common_mlp_encoder_forward(params, H1, A1, S, R, H2, A2, S2, R2, lambda_1):
    """Mirrors CommonMLPEncoder.forward (eval mode: dropout == identity)."""
    w_enc, w_dec, weight1, weight2 = params
    n, h2 = H1.shape
    h3 = w_enc.shape[1]
    n_edges = S.shape[0]
    assert R.shape[0] == n_edges and S2.shape[0] == n_edges and R2.shape[0] == n_edges

    # Stack the two views so the fused kernel sees them as a leading axis.
    H = jnp.stack([H1, H2])                                   # (2, n, h2)
    A = jnp.stack([A1, A2])                                   # (2, n, n)
    Wself = jnp.stack([weight1, weight2])                     # (2, n, n)

    # One-hot selection rows for the structure-loss gather: [S rows | R rows].
    idx = jnp.stack([jnp.concatenate([S, R]),
                     jnp.concatenate([S2, R2])]).astype(jnp.int32)   # (2, 2E)
    sel = jax.nn.one_hot(idx, n, dtype=jnp.float32)                  # (2, 2E, n)
    mask = (1.0 - jnp.eye(n)).astype(jnp.float32)                    # (n, n)

    V = _views_per_grid_step()            # views per grid step (1 or 2)
    grid = (2 // V,)

    if V == 1:
        vmap3 = lambda v: (v, 0, 0)       # one view per grid step
        semantics = ("parallel",)         # shard views across TensorCores
    else:
        vmap3 = lambda v: (0, 0, 0)       # both views in the single step
        semantics = ("arbitrary",)
    cmap2 = lambda v: (0, 0)              # shared weights / mask: VMEM-resident

    in_specs = [
        pl.BlockSpec((V, n, h2),           vmap3),   # H
        pl.BlockSpec((V, n, n),            vmap3),   # A
        pl.BlockSpec((V, n, n),            vmap3),   # self-expression weight
        pl.BlockSpec((V, 2 * n_edges, n),  vmap3),   # one-hot gather rows
        pl.BlockSpec((n, n),               cmap2),   # 1 - eye mask
        pl.BlockSpec((h2, h3),             cmap2),   # shared w_enc
        pl.BlockSpec((h3, h2),             cmap2),   # shared w_dec
    ]
    out_specs = (
        pl.BlockSpec((V, n, n),   vmap3),            # coef per view
        pl.BlockSpec((V, 1, 128), vmap3),            # loss terms per view
    )

    coef, losses = pl.pallas_call(
        functools.partial(_fused_kernel, n_edges=n_edges),
        out_shape=(
            jax.ShapeDtypeStruct((2, n, n), jnp.float32),
            jax.ShapeDtypeStruct((2, 1, 128), jnp.float32),
        ),
        grid_spec=pltpu.PrefetchScalarGridSpec(
            num_scalar_prefetch=0, grid=grid,
            in_specs=in_specs, out_specs=out_specs),
        compiler_params=pltpu.CompilerParams(dimension_semantics=semantics),
    )(H, A, Wself, sel, mask, w_enc, w_dec)

    # Collapsed epilogue: one reduce over views + one dot with a static weight
    # vector (lambda_1 is a static Python float).
    per = jnp.sum(losses, axis=(0, 1))                                # (128,)
    w_vec = jnp.array([1.0, 1.0, 1.0, float(lambda_1)] + [0.0] * 124,
                      dtype=jnp.float32)
    loss = jnp.dot(per, w_vec)
    ft_loss, SE_loss, C_Regular, st_loss = per[0], per[1], per[2], per[3]
    return coef[0], coef[1], loss, ft_loss, st_loss, SE_loss, C_Regular


# --------------------------------------------------------- pure-JAX reference
def _reference_forward(params, H1, A1, S, R, H2, A2, S2, R2, lambda_1):
    w_enc, w_dec, weight1, weight2 = params

    def gcn(x, w, a):
        return jax.nn.elu(a @ (x @ w))

    def view(Hv, Av, Wv, Sv, Rv):
        Z = gcn(Hv, w_enc, Av)
        coef = Wv - jnp.diag(jnp.diag(Wv))
        ZC = coef @ Z
        H_ = gcn(ZC, w_dec, Av)
        mse_rec = jnp.mean((Hv - H_) ** 2)
        se = 0.5 * jnp.mean((Z - ZC) ** 2)
        creg = jnp.sum(jnp.abs(coef))
        x = jnp.sum(Z[Sv] * Z[Rv], axis=-1)
        st = jnp.sum(-jnp.log(jax.nn.sigmoid(x)))
        return coef, mse_rec, se, creg, st

    c1, m1, s1, cr1, st1 = view(H1, A1, weight1, S, R)
    c2, m2, s2, cr2, st2 = view(H2, A2, weight2, S2, R2)
    ft = m1 + m2
    st = st1 + st2
    se = s1 + s2
    cr = cr1 + cr2
    return c1, c2, ft + lambda_1 * st + se + cr, ft, st, se, cr


# --------------------------------------------------------------------- driver
def _xavier_uniform(key, shape, gain):
    fan_in, fan_out = shape
    bound = gain * float(np.sqrt(6.0 / (fan_in + fan_out)))
    return jax.random.uniform(key, shape, jnp.float32, minval=-bound, maxval=bound)


if __name__ == "__main__":
    # args: n_nodes=64, hidden2=32, hidden3=16, dropout (eval -> unused), lambda_1=1.0
    n_nodes, hidden2, hidden3, n_edges = 64, 32, 16, 8
    lambda_1 = 1.0

    key = jax.random.PRNGKey(0)
    k = jax.random.split(key, 10)

    # deterministic parameter init (mirrors __init__ shapes)
    w_enc = _xavier_uniform(k[0], (hidden2, hidden3), gain=float(np.sqrt(2.0)))
    w_dec = _xavier_uniform(k[1], (hidden3, hidden2), gain=float(np.sqrt(2.0)))
    weight1 = 0.0001 * jnp.ones((n_nodes, n_nodes), jnp.float32)
    weight2 = 0.0001 * jnp.ones((n_nodes, n_nodes), jnp.float32)
    params = (w_enc, w_dec, weight1, weight2)

    # inputs
    H1 = jax.random.normal(k[2], (n_nodes, hidden2), jnp.float32)
    H2 = jax.random.normal(k[3], (n_nodes, hidden2), jnp.float32)
    A1 = jax.random.uniform(k[4], (n_nodes, n_nodes), jnp.float32) / n_nodes
    A2 = jax.random.uniform(k[5], (n_nodes, n_nodes), jnp.float32) / n_nodes
    S = jax.random.randint(k[6], (n_edges,), 0, n_nodes)
    R = jax.random.randint(k[7], (n_edges,), 0, n_nodes)
    S2 = jax.random.randint(k[8], (n_edges,), 0, n_nodes)
    R2 = jax.random.randint(k[9], (n_edges,), 0, n_nodes)

    fwd = jax.jit(common_mlp_encoder_forward, static_argnums=(9,))
    out = fwd(params, H1, A1, S, R, H2, A2, S2, R2, lambda_1)
    jax.block_until_ready(out)

    coef1, coef2, loss, ft_loss, st_loss, SE_loss, C_Regular = out
    assert coef1.shape == (n_nodes, n_nodes) and coef2.shape == (n_nodes, n_nodes)
    assert all(bool(jnp.isfinite(v)) for v in (loss, ft_loss, st_loss, SE_loss, C_Regular))

    # correctness check against a pure-JAX reference (loose tol for MXU precision)
    ref = _reference_forward(params, H1, A1, S, R, H2, A2, S2, R2, lambda_1)
    np.testing.assert_allclose(np.asarray(coef1), np.asarray(ref[0]), rtol=1e-5, atol=1e-7)
    np.testing.assert_allclose(np.asarray(coef2), np.asarray(ref[1]), rtol=1e-5, atol=1e-7)
    for got, want in zip((loss, ft_loss, st_loss, SE_loss, C_Regular), ref[2:]):
        np.testing.assert_allclose(np.asarray(got), np.asarray(want), rtol=2e-2, atol=1e-3)

    print("KERNEL_OK")
</pallas_src>

<mosaic_0001>
module attributes {stable_mosaic.version = 11 : i64} {
  func.func @_fused_kernel(%arg0: i32, %arg1: memref<2x64x32xf32, #tpu.memory_space<vmem>>, %arg2: memref<2x64x64xf32, #tpu.memory_space<vmem>>, %arg3: memref<2x64x64xf32, #tpu.memory_space<vmem>>, %arg4: memref<2x16x64xf32, #tpu.memory_space<vmem>>, %arg5: memref<64x64xf32, #tpu.memory_space<vmem>>, %arg6: memref<32x16xf32, #tpu.memory_space<vmem>>, %arg7: memref<16x32xf32, #tpu.memory_space<vmem>>, %arg8: memref<2x64x64xf32, #tpu.memory_space<vmem>>, %arg9: memref<2x1x128xf32, #tpu.memory_space<vmem>>) attributes {dimension_semantics = [#tpu.dimension_semantics<arbitrary>], iteration_bounds = array<i64: 1>, scalar_prefetch = 0 : i64, scratch_operands = 0 : i64, tpu.core_type = #tpu.core_type<tc>, window_params = [{pipeline_mode = #tpu.pipeline_mode<synchronous>, transform_indices = @transform_0, window_bounds = array<i64: 2, 64, 32>}, {pipeline_mode = #tpu.pipeline_mode<synchronous>, transform_indices = @transform_1, window_bounds = array<i64: 2, 64, 64>}, {pipeline_mode = #tpu.pipeline_mode<synchronous>, transform_indices = @transform_2, window_bounds = array<i64: 2, 64, 64>}, {pipeline_mode = #tpu.pipeline_mode<synchronous>, transform_indices = @transform_3, window_bounds = array<i64: 2, 16, 64>}, {pipeline_mode = #tpu.pipeline_mode<synchronous>, transform_indices = @transform_4, window_bounds = array<i64: 64, 64>}, {pipeline_mode = #tpu.pipeline_mode<synchronous>, transform_indices = @transform_5, window_bounds = array<i64: 32, 16>}, {pipeline_mode = #tpu.pipeline_mode<synchronous>, transform_indices = @transform_6, window_bounds = array<i64: 16, 32>}, {pipeline_mode = #tpu.pipeline_mode<synchronous>, transform_indices = @transform_7, window_bounds = array<i64: 2, 64, 64>}, {pipeline_mode = #tpu.pipeline_mode<synchronous>, transform_indices = @transform_8, window_bounds = array<i64: 2, 1, 128>}]} {
    %c0 = arith.constant 0 : index
    %c0_0 = arith.constant 0 : index
    %0 = vector.load %arg5[%c0, %c0_0] : memref<64x64xf32, #tpu.memory_space<vmem>>, vector<64x64xf32>
    %c0_1 = arith.constant 0 : index
    %c0_2 = arith.constant 0 : index
    %1 = vector.load %arg6[%c0_1, %c0_2] : memref<32x16xf32, #tpu.memory_space<vmem>>, vector<32x16xf32>
    %c0_3 = arith.constant 0 : index
    %c0_4 = arith.constant 0 : index
    %2 = vector.load %arg7[%c0_3, %c0_4] : memref<16x32xf32, #tpu.memory_space<vmem>>, vector<16x32xf32>
    %3 = tpu.iota {dimensions = array<i32: 1>} : vector<1x128xi32>
    %c0_5 = arith.constant 0 : index
    %c0_6 = arith.constant 0 : index
    %c0_7 = arith.constant 0 : index
    %4 = vector.load %arg1[%c0_5, %c0_6, %c0_7] : memref<2x64x32xf32, #tpu.memory_space<vmem>>, vector<1x64x32xf32>
    %5 = vector.shape_cast %4 : vector<1x64x32xf32> to vector<64x32xf32>
    %c0_8 = arith.constant 0 : index
    %c0_9 = arith.constant 0 : index
    %c0_10 = arith.constant 0 : index
    %6 = vector.load %arg2[%c0_8, %c0_9, %c0_10] : memref<2x64x64xf32, #tpu.memory_space<vmem>>, vector<1x64x64xf32>
    %7 = vector.shape_cast %6 : vector<1x64x64xf32> to vector<64x64xf32>
    %cst = arith.constant dense<0.000000e+00> : vector<64x16xf32>
    %8 = tpu.matmul %5, %1, %cst {dimension_numbers = #tpu.dot_dimension_numbers<[1], [0], [0], [1], [0, 0, 1, 1], [], []>} : vector<64x32xf32>, vector<32x16xf32>, vector<64x16xf32> -> vector<64x16xf32>
    %cst_11 = arith.constant dense<0.000000e+00> : vector<64x16xf32>
    %9 = tpu.matmul %7, %8, %cst_11 {dimension_numbers = #tpu.dot_dimension_numbers<[1], [0], [0], [1], [0, 0, 1, 1], [], []>} : vector<64x64xf32>, vector<64x16xf32>, vector<64x16xf32> -> vector<64x16xf32>
    %cst_12 = arith.constant 0.000000e+00 : f32
    %10 = vector.broadcast %cst_12 : f32 to vector<64x16xf32>
    %11 = arith.cmpf ogt, %9, %10 : vector<64x16xf32>
    %cst_13 = arith.constant 0.000000e+00 : f32
    %12 = vector.broadcast %cst_13 : f32 to vector<64x16xf32>
    %13 = arith.minimumf %9, %12 : vector<64x16xf32>
    %14 = math.exp %13 : vector<64x16xf32>
    %cst_14 = arith.constant 1.000000e+00 : f32
    %15 = vector.broadcast %cst_14 : f32 to vector<64x16xf32>
    %16 = arith.subf %14, %15 : vector<64x16xf32>
    %17 = arith.select %11, %9, %16 : vector<64x16xi1>, vector<64x16xf32>
    %c0_15 = arith.constant 0 : index
    %c0_16 = arith.constant 0 : index
    %c0_17 = arith.constant 0 : index
    %18 = vector.load %arg3[%c0_15, %c0_16, %c0_17] : memref<2x64x64xf32, #tpu.memory_space<vmem>>, vector<1x64x64xf32>
    %19 = vector.shape_cast %18 : vector<1x64x64xf32> to vector<64x64xf32>
    %20 = arith.mulf %19, %0 : vector<64x64xf32>
    %c0_18 = arith.constant 0 : index
    %c0_19 = arith.constant 0 : index
    %c0_20 = arith.constant 0 : index
    %21 = vector.load %arg8[%c0_18, %c0_19, %c0_20] : memref<2x64x64xf32, #tpu.memory_space<vmem>>, vector<1x64x64xf32>
    %22 = vector.shape_cast %21 : vector<1x64x64xf32> to vector<64x64xf32>
    %23 = vector.shape_cast %20 : vector<64x64xf32> to vector<1x64x64xf32>
    tpu.vector_store %arg8[%c0_18, %c0_19, %c0_20], %23 {strides = array<i32>} : memref<2x64x64xf32, #tpu.memory_space<vmem>>, vector<1x64x64xf32>,
    %cst_21 = arith.constant dense<0.000000e+00> : vector<64x16xf32>
    %24 = tpu.matmul %20, %17, %cst_21 {dimension_numbers = #tpu.dot_dimension_numbers<[1], [0], [0], [1], [0, 0, 1, 1], [], []>} : vector<64x64xf32>, vector<64x16xf32>, vector<64x16xf32> -> vector<64x16xf32>
    %cst_22 = arith.constant dense<0.000000e+00> : vector<64x32xf32>
    %25 = tpu.matmul %24, %2, %cst_22 {dimension_numbers = #tpu.dot_dimension_numbers<[1], [0], [0], [1], [0, 0, 1, 1], [], []>} : vector<64x16xf32>, vector<16x32xf32>, vector<64x32xf32> -> vector<64x32xf32>
    %cst_23 = arith.constant dense<0.000000e+00> : vector<64x32xf32>
    %26 = tpu.matmul %7, %25, %cst_23 {dimension_numbers = #tpu.dot_dimension_numbers<[1], [0], [0], [1], [0, 0, 1, 1], [], []>} : vector<64x64xf32>, vector<64x32xf32>, vector<64x32xf32> -> vector<64x32xf32>
    %cst_24 = arith.constant 0.000000e+00 : f32
    %27 = vector.broadcast %cst_24 : f32 to vector<64x32xf32>
    %28 = arith.cmpf ogt, %26, %27 : vector<64x32xf32>
    %cst_25 = arith.constant 0.000000e+00 : f32
    %29 = vector.broadcast %cst_25 : f32 to vector<64x32xf32>
    %30 = arith.minimumf %26, %29 : vector<64x32xf32>
    %31 = math.exp %30 : vector<64x32xf32>
    %cst_26 = arith.constant 1.000000e+00 : f32
    %32 = vector.broadcast %cst_26 : f32 to vector<64x32xf32>
    %33 = arith.subf %31, %32 : vector<64x32xf32>
    %34 = arith.select %28, %26, %33 : vector<64x32xi1>, vector<64x32xf32>
    %35 = arith.subf %5, %34 : vector<64x32xf32>
    %36 = arith.mulf %35, %35 : vector<64x32xf32>
    %37 = vector.shape_cast %36 : vector<64x32xf32> to vector<1x64x32xf32>
    %cst_27 = arith.constant dense<0.000000e+00> : vector<1xf32>
    %38 = vector.multi_reduction <add>, %37, %cst_27 [1, 2] : vector<1x64x32xf32> to vector<1xf32>
    %39 = vector.shape_cast %38 : vector<1xf32> to vector<1x1x1xf32>
    %40 = vector.extract %39[0, 0, 0] : f32 from vector<1x1x1xf32>
    %cst_28 = arith.constant 2.048000e+03 : f32
    %41 = arith.divf %40, %cst_28 : f32
    %42 = arith.subf %17, %24 : vector<64x16xf32>
    %43 = arith.mulf %42, %42 : vector<64x16xf32>
    %44 = vector.shape_cast %43 : vector<64x16xf32> to vector<1x64x16xf32>
    %cst_29 = arith.constant dense<0.000000e+00> : vector<1xf32>
    %45 = vector.multi_reduction <add>, %44, %cst_29 [1, 2] : vector<1x64x16xf32> to vector<1xf32>
    %46 = vector.shape_cast %45 : vector<1xf32> to vector<1x1x1xf32>
    %47 = vector.extract %46[0, 0, 0] : f32 from vector<1x1x1xf32>
    %cst_30 = arith.constant 1.024000e+03 : f32
    %48 = arith.divf %47, %cst_30 : f32
    %cst_31 = arith.constant 5.000000e-01 : f32
    %49 = arith.mulf %cst_31, %48 : f32
    %50 = math.absf %20 : vector<64x64xf32>
    %51 = vector.shape_cast %50 : vector<64x64xf32> to vector<1x64x64xf32>
    %cst_32 = arith.constant dense<0.000000e+00> : vector<1xf32>
    %52 = vector.multi_reduction <add>, %51, %cst_32 [1, 2] : vector<1x64x64xf32> to vector<1xf32>
    %53 = vector.shape_cast %52 : vector<1xf32> to vector<1x1x1xf32>
    %54 = vector.extract %53[0, 0, 0] : f32 from vector<1x1x1xf32>
    %c0_33 = arith.constant 0 : index
    %c0_34 = arith.constant 0 : index
    %c0_35 = arith.constant 0 : index
    %55 = vector.load %arg4[%c0_33, %c0_34, %c0_35] : memref<2x16x64xf32, #tpu.memory_space<vmem>>, vector<1x16x64xf32>
    %56 = vector.shape_cast %55 : vector<1x16x64xf32> to vector<16x64xf32>
    %cst_36 = arith.constant dense<0.000000e+00> : vector<16x16xf32>
    %57 = tpu.matmul %56, %17, %cst_36 {dimension_numbers = #tpu.dot_dimension_numbers<[1], [0], [0], [1], [0, 0, 1, 1], [], []>} : vector<16x64xf32>, vector<64x16xf32>, vector<16x16xf32> -> vector<16x16xf32>
    %58 = vector.extract_strided_slice %57 {offsets = [0, 0], sizes = [8, 16], strides = [1, 1]} : vector<16x16xf32> to vector<8x16xf32>
    %59 = vector.extract_strided_slice %57 {offsets = [8, 0], sizes = [8, 16], strides = [1, 1]} : vector<16x16xf32> to vector<8x16xf32>
    %60 = arith.mulf %58, %59 : vector<8x16xf32>
    %cst_37 = arith.constant dense<0.000000e+00> : vector<8xf32>
    %61 = vector.multi_reduction <add>, %60, %cst_37 [1] : vector<8x16xf32> to vector<8xf32>
    %62 = vector.shape_cast %61 : vector<8xf32> to vector<8x1xf32>
    %cst_38 = arith.constant 0.000000e+00 : f32
    %63 = vector.broadcast %cst_38 : f32 to vector<8x1xf32>
    %64 = arith.subf %63, %62 : vector<8x1xf32>
    %cst_39 = arith.constant 0.000000e+00 : f32
    %65 = vector.broadcast %cst_39 : f32 to vector<8x1xf32>
    %66 = arith.maximumf %64, %65 : vector<8x1xf32>
    %67 = math.absf %62 : vector<8x1xf32>
    %cst_40 = arith.constant 0.000000e+00 : f32
    %68 = vector.broadcast %cst_40 : f32 to vector<8x1xf32>
    %69 = arith.subf %68, %67 : vector<8x1xf32>
    %70 = math.exp %69 : vector<8x1xf32>
    %cst_41 = arith.constant 1.000000e+00 : f32
    %71 = vector.broadcast %cst_41 : f32 to vector<8x1xf32>
    %72 = arith.addf %71, %70 : vector<8x1xf32>
    %73 = math.log %72 : vector<8x1xf32>
    %74 = arith.addf %66, %73 : vector<8x1xf32>
    %75 = vector.shape_cast %74 : vector<8x1xf32> to vector<1x8x1xf32>
    %cst_42 = arith.constant dense<0.000000e+00> : vector<1xf32>
    %76 = vector.multi_reduction <add>, %75, %cst_42 [1, 2] : vector<1x8x1xf32> to vector<1xf32>
    %77 = vector.shape_cast %76 : vector<1xf32> to vector<1x1x1xf32>
    %78 = vector.extract %77[0, 0, 0] : f32 from vector<1x1x1xf32>
    %c0_i32 = arith.constant 0 : i32
    %79 = vector.broadcast %c0_i32 : i32 to vector<1x128xi32>
    %80 = arith.cmpi eq, %3, %79 : vector<1x128xi32>
    %cst_43 = arith.constant 0.000000e+00 : f32
    %81 = vector.broadcast %41 : f32 to vector<1x128xf32>
    %82 = vector.broadcast %cst_43 : f32 to vector<1x128xf32>
    %83 = arith.select %80, %81, %82 : vector<1x128xi1>, vector<1x128xf32>
    %c1_i32 = arith.constant 1 : i32
    %84 = vector.broadcast %c1_i32 : i32 to vector<1x128xi32>
    %85 = arith.cmpi eq, %3, %84 : vector<1x128xi32>
    %cst_44 = arith.constant 0.000000e+00 : f32
    %86 = vector.broadcast %49 : f32 to vector<1x128xf32>
    %87 = vector.broadcast %cst_44 : f32 to vector<1x128xf32>
    %88 = arith.select %85, %86, %87 : vector<1x128xi1>, vector<1x128xf32>
    %89 = arith.addf %83, %88 : vector<1x128xf32>
    %c2_i32 = arith.constant 2 : i32
    %90 = vector.broadcast %c2_i32 : i32 to vector<1x128xi32>
    %91 = arith.cmpi eq, %3, %90 : vector<1x128xi32>
    %cst_45 = arith.constant 0.000000e+00 : f32
    %92 = vector.broadcast %54 : f32 to vector<1x128xf32>
    %93 = vector.broadcast %cst_45 : f32 to vector<1x128xf32>
    %94 = arith.select %91, %92, %93 : vector<1x128xi1>, vector<1x128xf32>
    %95 = arith.addf %89, %94 : vector<1x128xf32>
    %c3_i32 = arith.constant 3 : i32
    %96 = vector.broadcast %c3_i32 : i32 to vector<1x128xi32>
    %97 = arith.cmpi eq, %3, %96 : vector<1x128xi32>
    %cst_46 = arith.constant 0.000000e+00 : f32
    %98 = vector.broadcast %78 : f32 to vector<1x128xf32>
    %99 = vector.broadcast %cst_46 : f32 to vector<1x128xf32>
    %100 = arith.select %97, %98, %99 : vector<1x128xi1>, vector<1x128xf32>
    %101 = arith.addf %95, %100 : vector<1x128xf32>
    %c0_47 = arith.constant 0 : index
    %c0_48 = arith.constant 0 : index
    %c0_49 = arith.constant 0 : index
    %102 = vector.load %arg9[%c0_47, %c0_48, %c0_49] : memref<2x1x128xf32, #tpu.memory_space<vmem>>, vector<1x1x128xf32>
    %103 = vector.shape_cast %102 : vector<1x1x128xf32> to vector<1x128xf32>
    %104 = vector.shape_cast %101 : vector<1x128xf32> to vector<1x1x128xf32>
    tpu.vector_store %arg9[%c0_47, %c0_48, %c0_49], %104 {strides = array<i32>} : memref<2x1x128xf32, #tpu.memory_space<vmem>>, vector<1x1x128xf32>,
    %c1 = arith.constant 1 : index
    %c0_50 = arith.constant 0 : index
    %c0_51 = arith.constant 0 : index
    %105 = vector.load %arg1[%c1, %c0_50, %c0_51] : memref<2x64x32xf32, #tpu.memory_space<vmem>>, vector<1x64x32xf32>
    %106 = vector.shape_cast %105 : vector<1x64x32xf32> to vector<64x32xf32>
    %c1_52 = arith.constant 1 : index
    %c0_53 = arith.constant 0 : index
    %c0_54 = arith.constant 0 : index
    %107 = vector.load %arg2[%c1_52, %c0_53, %c0_54] : memref<2x64x64xf32, #tpu.memory_space<vmem>>, vector<1x64x64xf32>
    %108 = vector.shape_cast %107 : vector<1x64x64xf32> to vector<64x64xf32>
    %cst_55 = arith.constant dense<0.000000e+00> : vector<64x16xf32>
    %109 = tpu.matmul %106, %1, %cst_55 {dimension_numbers = #tpu.dot_dimension_numbers<[1], [0], [0], [1], [0, 0, 1, 1], [], []>} : vector<64x32xf32>, vector<32x16xf32>, vector<64x16xf32> -> vector<64x16xf32>
    %cst_56 = arith.constant dense<0.000000e+00> : vector<64x16xf32>
    %110 = tpu.matmul %108, %109, %cst_56 {dimension_numbers = #tpu.dot_dimension_numbers<[1], [0], [0], [1], [0, 0, 1, 1], [], []>} : vector<64x64xf32>, vector<64x16xf32>, vector<64x16xf32> -> vector<64x16xf32>
    %cst_57 = arith.constant 0.000000e+00 : f32
    %111 = vector.broadcast %cst_57 : f32 to vector<64x16xf32>
    %112 = arith.cmpf ogt, %110, %111 : vector<64x16xf32>
    %cst_58 = arith.constant 0.000000e+00 : f32
    %113 = vector.broadcast %cst_58 : f32 to vector<64x16xf32>
    %114 = arith.minimumf %110, %113 : vector<64x16xf32>
    %115 = math.exp %114 : vector<64x16xf32>
    %cst_59 = arith.constant 1.000000e+00 : f32
    %116 = vector.broadcast %cst_59 : f32 to vector<64x16xf32>
    %117 = arith.subf %115, %116 : vector<64x16xf32>
    %118 = arith.select %112, %110, %117 : vector<64x16xi1>, vector<64x16xf32>
    %c1_60 = arith.constant 1 : index
    %c0_61 = arith.constant 0 : index
    %c0_62 = arith.constant 0 : index
    %119 = vector.load %arg3[%c1_60, %c0_61, %c0_62] : memref<2x64x64xf32, #tpu.memory_space<vmem>>, vector<1x64x64xf32>
    %120 = vector.shape_cast %119 : vector<1x64x64xf32> to vector<64x64xf32>
    %121 = arith.mulf %120, %0 : vector<64x64xf32>
    %c1_63 = arith.constant 1 : index
    %c0_64 = arith.constant 0 : index
    %c0_65 = arith.constant 0 : index
    %122 = vector.load %arg8[%c1_63, %c0_64, %c0_65] : memref<2x64x64xf32, #tpu.memory_space<vmem>>, vector<1x64x64xf32>
    %123 = vector.shape_cast %122 : vector<1x64x64xf32> to vector<64x64xf32>
    %124 = vector.shape_cast %121 : vector<64x64xf32> to vector<1x64x64xf32>
    tpu.vector_store %arg8[%c1_63, %c0_64, %c0_65], %124 {strides = array<i32>} : memref<2x64x64xf32, #tpu.memory_space<vmem>>, vector<1x64x64xf32>,
    %cst_66 = arith.constant dense<0.000000e+00> : vector<64x16xf32>
    %125 = tpu.matmul %121, %118, %cst_66 {dimension_numbers = #tpu.dot_dimension_numbers<[1], [0], [0], [1], [0, 0, 1, 1], [], []>} : vector<64x64xf32>, vector<64x16xf32>, vector<64x16xf32> -> vector<64x16xf32>
    %cst_67 = arith.constant dense<0.000000e+00> : vector<64x32xf32>
    %126 = tpu.matmul %125, %2, %cst_67 {dimension_numbers = #tpu.dot_dimension_numbers<[1], [0], [0], [1], [0, 0, 1, 1], [], []>} : vector<64x16xf32>, vector<16x32xf32>, vector<64x32xf32> -> vector<64x32xf32>
    %cst_68 = arith.constant dense<0.000000e+00> : vector<64x32xf32>
    %127 = tpu.matmul %108, %126, %cst_68 {dimension_numbers = #tpu.dot_dimension_numbers<[1], [0], [0], [1], [0, 0, 1, 1], [], []>} : vector<64x64xf32>, vector<64x32xf32>, vector<64x32xf32> -> vector<64x32xf32>
    %cst_69 = arith.constant 0.000000e+00 : f32
    %128 = vector.broadcast %cst_69 : f32 to vector<64x32xf32>
    %129 = arith.cmpf ogt, %127, %128 : vector<64x32xf32>
    %cst_70 = arith.constant 0.000000e+00 : f32
    %130 = vector.broadcast %cst_70 : f32 to vector<64x32xf32>
    %131 = arith.minimumf %127, %130 : vector<64x32xf32>
    %132 = math.exp %131 : vector<64x32xf32>
    %cst_71 = arith.constant 1.000000e+00 : f32
    %133 = vector.broadcast %cst_71 : f32 to vector<64x32xf32>
    %134 = arith.subf %132, %133 : vector<64x32xf32>
    %135 = arith.select %129, %127, %134 : vector<64x32xi1>, vector<64x32xf32>
    %136 = arith.subf %106, %135 : vector<64x32xf32>
    %137 = arith.mulf %136, %136 : vector<64x32xf32>
    %138 = vector.shape_cast %137 : vector<64x32xf32> to vector<1x64x32xf32>
    %cst_72 = arith.constant dense<0.000000e+00> : vector<1xf32>
    %139 = vector.multi_reduction <add>, %138, %cst_72 [1, 2] : vector<1x64x32xf32> to vector<1xf32>
    %140 = vector.shape_cast %139 : vector<1xf32> to vector<1x1x1xf32>
    %141 = vector.extract %140[0, 0, 0] : f32 from vector<1x1x1xf32>
    %cst_73 = arith.constant 2.048000e+03 : f32
    %142 = arith.divf %141, %cst_73 : f32
    %143 = arith.subf %118, %125 : vector<64x16xf32>
    %144 = arith.mulf %143, %143 : vector<64x16xf32>
    %145 = vector.shape_cast %144 : vector<64x16xf32> to vector<1x64x16xf32>
    %cst_74 = arith.constant dense<0.000000e+00> : vector<1xf32>
    %146 = vector.multi_reduction <add>, %145, %cst_74 [1, 2] : vector<1x64x16xf32> to vector<1xf32>
    %147 = vector.shape_cast %146 : vector<1xf32> to vector<1x1x1xf32>
    %148 = vector.extract %147[0, 0, 0] : f32 from vector<1x1x1xf32>
    %cst_75 = arith.constant 1.024000e+03 : f32
    %149 = arith.divf %148, %cst_75 : f32
    %cst_76 = arith.constant 5.000000e-01 : f32
    %150 = arith.mulf %cst_76, %149 : f32
    %151 = math.absf %121 : vector<64x64xf32>
    %152 = vector.shape_cast %151 : vector<64x64xf32> to vector<1x64x64xf32>
    %cst_77 = arith.constant dense<0.000000e+00> : vector<1xf32>
    %153 = vector.multi_reduction <add>, %152, %cst_77 [1, 2] : vector<1x64x64xf32> to vector<1xf32>
    %154 = vector.shape_cast %153 : vector<1xf32> to vector<1x1x1xf32>
    %155 = vector.extract %154[0, 0, 0] : f32 from vector<1x1x1xf32>
    %c1_78 = arith.constant 1 : index
    %c0_79 = arith.constant 0 : index
    %c0_80 = arith.constant 0 : index
    %156 = vector.load %arg4[%c1_78, %c0_79, %c0_80] : memref<2x16x64xf32, #tpu.memory_space<vmem>>, vector<1x16x64xf32>
    %157 = vector.shape_cast %156 : vector<1x16x64xf32> to vector<16x64xf32>
    %cst_81 = arith.constant dense<0.000000e+00> : vector<16x16xf32>
    %158 = tpu.matmul %157, %118, %cst_81 {dimension_numbers = #tpu.dot_dimension_numbers<[1], [0], [0], [1], [0, 0, 1, 1], [], []>} : vector<16x64xf32>, vector<64x16xf32>, vector<16x16xf32> -> vector<16x16xf32>
    %159 = vector.extract_strided_slice %158 {offsets = [0, 0], sizes = [8, 16], strides = [1, 1]} : vector<16x16xf32> to vector<8x16xf32>
    %160 = vector.extract_strided_slice %158 {offsets = [8, 0], sizes = [8, 16], strides = [1, 1]} : vector<16x16xf32> to vector<8x16xf32>
    %161 = arith.mulf %159, %160 : vector<8x16xf32>
    %cst_82 = arith.constant dense<0.000000e+00> : vector<8xf32>
    %162 = vector.multi_reduction <add>, %161, %cst_82 [1] : vector<8x16xf32> to vector<8xf32>
    %163 = vector.shape_cast %162 : vector<8xf32> to vector<8x1xf32>
    %cst_83 = arith.constant 0.000000e+00 : f32
    %164 = vector.broadcast %cst_83 : f32 to vector<8x1xf32>
    %165 = arith.subf %164, %163 : vector<8x1xf32>
    %cst_84 = arith.constant 0.000000e+00 : f32
    %166 = vector.broadcast %cst_84 : f32 to vector<8x1xf32>
    %167 = arith.maximumf %165, %166 : vector<8x1xf32>
    %168 = math.absf %163 : vector<8x1xf32>
    %cst_85 = arith.constant 0.000000e+00 : f32
    %169 = vector.broadcast %cst_85 : f32 to vector<8x1xf32>
    %170 = arith.subf %169, %168 : vector<8x1xf32>
    %171 = math.exp %170 : vector<8x1xf32>
    %cst_86 = arith.constant 1.000000e+00 : f32
    %172 = vector.broadcast %cst_86 : f32 to vector<8x1xf32>
    %173 = arith.addf %172, %171 : vector<8x1xf32>
    %174 = math.log %173 : vector<8x1xf32>
    %175 = arith.addf %167, %174 : vector<8x1xf32>
    %176 = vector.shape_cast %175 : vector<8x1xf32> to vector<1x8x1xf32>
    %cst_87 = arith.constant dense<0.000000e+00> : vector<1xf32>
    %177 = vector.multi_reduction <add>, %176, %cst_87 [1, 2] : vector<1x8x1xf32> to vector<1xf32>
    %178 = vector.shape_cast %177 : vector<1xf32> to vector<1x1x1xf32>
    %179 = vector.extract %178[0, 0, 0] : f32 from vector<1x1x1xf32>
    %c0_i32_88 = arith.constant 0 : i32
    %180 = vector.broadcast %c0_i32_88 : i32 to vector<1x128xi32>
    %181 = arith.cmpi eq, %3, %180 : vector<1x128xi32>
    %cst_89 = arith.constant 0.000000e+00 : f32
    %182 = vector.broadcast %142 : f32 to vector<1x128xf32>
    %183 = vector.broadcast %cst_89 : f32 to vector<1x128xf32>
    %184 = arith.select %181, %182, %183 : vector<1x128xi1>, vector<1x128xf32>
    %c1_i32_90 = arith.constant 1 : i32
    %185 = vector.broadcast %c1_i32_90 : i32 to vector<1x128xi32>
    %186 = arith.cmpi eq, %3, %185 : vector<1x128xi32>
    %cst_91 = arith.constant 0.000000e+00 : f32
    %187 = vector.broadcast %150 : f32 to vector<1x128xf32>
    %188 = vector.broadcast %cst_91 : f32 to vector<1x128xf32>
    %189 = arith.select %186, %187, %188 : vector<1x128xi1>, vector<1x128xf32>
    %190 = arith.addf %184, %189 : vector<1x128xf32>
    %c2_i32_92 = arith.constant 2 : i32
    %191 = vector.broadcast %c2_i32_92 : i32 to vector<1x128xi32>
    %192 = arith.cmpi eq, %3, %191 : vector<1x128xi32>
    %cst_93 = arith.constant 0.000000e+00 : f32
    %193 = vector.broadcast %155 : f32 to vector<1x128xf32>
    %194 = vector.broadcast %cst_93 : f32 to vector<1x128xf32>
    %195 = arith.select %192, %193, %194 : vector<1x128xi1>, vector<1x128xf32>
    %196 = arith.addf %190, %195 : vector<1x128xf32>
    %c3_i32_94 = arith.constant 3 : i32
    %197 = vector.broadcast %c3_i32_94 : i32 to vector<1x128xi32>
    %198 = arith.cmpi eq, %3, %197 : vector<1x128xi32>
    %cst_95 = arith.constant 0.000000e+00 : f32
    %199 = vector.broadcast %179 : f32 to vector<1x128xf32>
    %200 = vector.broadcast %cst_95 : f32 to vector<1x128xf32>
    %201 = arith.select %198, %199, %200 : vector<1x128xi1>, vector<1x128xf32>
    %202 = arith.addf %196, %201 : vector<1x128xf32>
    %c1_96 = arith.constant 1 : index
    %c0_97 = arith.constant 0 : index
    %c0_98 = arith.constant 0 : index
    %203 = vector.load %arg9[%c1_96, %c0_97, %c0_98] : memref<2x1x128xf32, #tpu.memory_space<vmem>>, vector<1x1x128xf32>
    %204 = vector.shape_cast %203 : vector<1x1x128xf32> to vector<1x128xf32>
    %205 = vector.shape_cast %202 : vector<1x128xf32> to vector<1x1x128xf32>
    tpu.vector_store %arg9[%c1_96, %c0_97, %c0_98], %205 {strides = array<i32>} : memref<2x1x128xf32, #tpu.memory_space<vmem>>, vector<1x1x128xf32>,
    return
  }
  func.func @transform_0(%arg0: i32) -> (i32, i32, i32) {
    %c0_i32 = arith.constant 0 : i32
    %c0_i32_0 = arith.constant 0 : i32
    %c0_i32_1 = arith.constant 0 : i32
    %c0_i32_2 = arith.constant 0 : i32
    return %c0_i32, %c0_i32_0, %c0_i32_1 : i32, i32, i32
  }
  func.func @transform_1(%arg0: i32) -> (i32, i32, i32) {
    %c0_i32 = arith.constant 0 : i32
    %c0_i32_0 = arith.constant 0 : i32
    %c0_i32_1 = arith.constant 0 : i32
    %c0_i32_2 = arith.constant 0 : i32
    return %c0_i32, %c0_i32_0, %c0_i32_1 : i32, i32, i32
  }
  func.func @transform_2(%arg0: i32) -> (i32, i32, i32) {
    %c0_i32 = arith.constant 0 : i32
    %c0_i32_0 = arith.constant 0 : i32
    %c0_i32_1 = arith.constant 0 : i32
    %c0_i32_2 = arith.constant 0 : i32
    return %c0_i32, %c0_i32_0, %c0_i32_1 : i32, i32, i32
  }
  func.func @transform_3(%arg0: i32) -> (i32, i32, i32) {
    %c0_i32 = arith.constant 0 : i32
    %c0_i32_0 = arith.constant 0 : i32
    %c0_i32_1 = arith.constant 0 : i32
    %c0_i32_2 = arith.constant 0 : i32
    return %c0_i32, %c0_i32_0, %c0_i32_1 : i32, i32, i32
  }
  func.func @transform_4(%arg0: i32) -> (i32, i32) {
    %c0_i32 = arith.constant 0 : i32
    %c0_i32_0 = arith.constant 0 : i32
    %c0_i32_1 = arith.constant 0 : i32
    return %c0_i32, %c0_i32_0 : i32, i32
  }
  func.func @transform_5(%arg0: i32) -> (i32, i32) {
    %c0_i32 = arith.constant 0 : i32
    %c0_i32_0 = arith.constant 0 : i32
    %c0_i32_1 = arith.constant 0 : i32
    return %c0_i32, %c0_i32_0 : i32, i32
  }
  func.func @transform_6(%arg0: i32) -> (i32, i32) {
    %c0_i32 = arith.constant 0 : i32
    %c0_i32_0 = arith.constant 0 : i32
    %c0_i32_1 = arith.constant 0 : i32
    return %c0_i32, %c0_i32_0 : i32, i32
  }
  func.func @transform_7(%arg0: i32) -> (i32, i32, i32) {
    %c0_i32 = arith.constant 0 : i32
    %c0_i32_0 = arith.constant 0 : i32
    %c0_i32_1 = arith.constant 0 : i32
    %c0_i32_2 = arith.constant 0 : i32
    return %c0_i32, %c0_i32_0, %c0_i32_1 : i32, i32, i32
  }
  func.func @transform_8(%arg0: i32) -> (i32, i32, i32) {
    %c0_i32 = arith.constant 0 : i32
    %c0_i32_0 = arith.constant 0 : i32
    %c0_i32_1 = arith.constant 0 : i32
    %c0_i32_2 = arith.constant 0 : i32
    return %c0_i32, %c0_i32_0, %c0_i32_1 : i32, i32, i32
  }
}

</mosaic_0001>

<bundles_post_ra>
// kernel: common_mlp_encoder_forward.1
= control target key start
LH: loop header
LB: loop body
LE: loop exit
PB: predicated region body
PF: predicated region fallthrough
CT: control target
= control target key end

     0   :  { %vm60_vm0 = vcmask 261120   ;;  %vm190_vm1 = vcmask 523264   ;;  %vm521_vm10 = vcmask 130048   ;;  %s3657_s5 = inlined_call_operand.vmem [shape: f32[32,16], index: 5, kind: input, shape index: {}]   ;;  %s3658_s0 = inlined_call_operand.vmem [shape: f32[2,64,32], index: 0, kind: input, shape index: {}]   ;;  %s3659_s1 = inlined_call_operand.vmem [shape: f32[2,64,64], index: 1, kind: input, shape index: {}]   ;;  %s3660_s6 = inlined_call_operand.vmem [shape: f32[16,32], index: 6, kind: input, shape index: {}]   ;;  %s3661_s2 = inlined_call_operand.vmem [shape: f32[2,64,64], index: 2, kind: input, shape index: {}]   ;;  %s3662_s4 = inlined_call_operand.vmem [shape: f32[64,64], index: 4, kind: input, shape index: {}]   ;;  %s3663_s7 = inlined_call_operand.vmem [shape: f32[2,64,64], index: 7, kind: output, shape index: {0}]   ;;  %s3664_s3 = inlined_call_operand.vmem [shape: f32[2,16,64], index: 3, kind: input, shape index: {}]   ;;  %s3665_s8 = inlined_call_operand.vmem [shape: f32[2,1,128], index: 8, kind: output, shape index: {1}]  }
   0x1   :  { %v36_v0 = vld [vmem:[%s3657_s5] sm:$0xff]  ;;  %v37_v1 = vld [vmem:[%s3657_s5 + $0x8] sm:$0xff]  ;;  %v38_v2 = vld [vmem:[%s3657_s5 + $0x10] sm:$0xff] }
   0x2   :  { %v2947_v3 = vpack.c.bf16 %v37_v1, %v36_v0  ;;  %v39_v4 = vld [vmem:[%s3657_s5 + $0x18] sm:$0xff]  ;;  %v2955_v5 = vld [vmem:[%s3658_s0] sm:$0xff]  ;;  %v2968_v7 = vld [vmem:[%s3658_s0 + $0x8] sm:$0xff] }
   0x3   :  { %v2957_v6 = vpack.c.bf16 %v39_v4, %v38_v2  ;;  %2375 = vmatprep.mubr.msk.f32.mxu0 %vm60_vm0, %v2955_v5  ;;  %v2973_v8 = vld [vmem:[%s3658_s0 + $0x10] sm:$0xff]  ;;  %v2982_v9 = vld [vmem:[%s3658_s0 + $0x18] sm:$0xff]  ;;  %v2987_v10 = vld [vmem:[%s3658_s0 + $0x20] sm:$0xff] }
   0x4   :  { %2646 = vmatprep.subr.bf16.mxu0 %v2947_v3  ;;  %v2996_v11 = vld [vmem:[%s3658_s0 + $0x28] sm:$0xff]  ;;  %v3001_v12 = vld [vmem:[%s3658_s0 + $0x30] sm:$0xff]  ;;  %v3010_v13 = vld [vmem:[%s3658_s0 + $0x38] sm:$0xff] }
   0x5   :  { %2648 = vmatpush3.bf16.msra.mxu0 %v2947_v3  ;;  %v3017_v14 = vld [vmem:[%s3659_s1] sm:$0xff]  ;;  %v3024_v27 = vld [vmem:[%s3659_s1 + $0x8] sm:$0xff]  ;;  %v3029_v28 = vld [vmem:[%s3659_s1 + $0x10] sm:$0xff] }
   0x6   :  { %2650 = vmatprep.subr.bf16.mxu0 %v2957_v6  ;;  %2403 = vmatprep.mubr.msk.f32.mxu1 %vm190_vm1, %v3017_v14  ;;  %v3038_v29 = vld [vmem:[%s3659_s1 + $0x18] sm:$0xff]  ;;  %v3043_v30 = vld [vmem:[%s3659_s1 + $0x20] sm:$0xff]  ;;  %v3052_v31 = vld [vmem:[%s3659_s1 + $0x28] sm:$0xff] }
   0x7   :  { %v3057_v32 = vld [vmem:[%s3659_s1 + $0x30] sm:$0xff]  ;;  %v3066_v33 = vld [vmem:[%s3659_s1 + $0x38] sm:$0xff]  ;;  %v40_v34 = vld [vmem:[%s3660_s6] sm:$0xff] }
   0x8   :  { %v41_v35 = vld [vmem:[%s3660_s6 + $0x8] sm:$0xff]  ;;  %v3083_v37 = vld [vmem:[%s3662_s4] sm:$0xff]  ;;  %v3117_v43 = vld [vmem:[%s3662_s4 + $0x10] sm:$0xff] }
   0x9   :  { %2652 = vmatpush3.bf16.msra.mxu0 %v2957_v6  ;;  %v3076_v36 = vpack.c.bf16 %v41_v35, %v40_v34  ;;  %v368_v38 = vld [vmem:[%s3661_s2] sm:$0xff]  ;;  %v3094_v40 = vld [vmem:[%s3662_s4 + $0x8] sm:$0xff]  ;;  %v370_v44 = vld [vmem:[%s3661_s2 + $0x10] sm:$0xff] }
   0xa   :  { %v3089_v39 = vmul.f32 %v368_v38, %v3083_v37  ;;  %v369_v41 = vld [vmem:[%s3661_s2 + $0x8] sm:$0xff]  ;;  %v3123_v45 = vmul.f32 %v370_v44, %v3117_v43  ;;  %v3128_v46 = vld [vmem:[%s3662_s4 + $0x18] sm:$0xff]  ;;  %v3149_v49 = vld [vmem:[%s3662_s4 + $0x20] sm:$0xff] }
   0xb   :  { %v3100_v42 = vmul.f32 %v369_v41, %v3094_v40  ;;  %v371_v47 = vld [vmem:[%s3661_s2 + $0x18] sm:$0xff]  ;;  %v372_v50 = vld [vmem:[%s3661_s2 + $0x20] sm:$0xff]  ;;  %v3160_v52 = vld [vmem:[%s3662_s4 + $0x28] sm:$0xff] }
   0xc   :  { %2376 = vmatmul.mubr.msk.f32.vlgmr.msra.gmra.mrb[0].mxu0 %vm60_vm0, %v2968_v7  ;;  %384 = vst.msk [vmem:[%s3663_s7] sm:$0xff] %vm190_vm1, %v3089_v39  ;;  %v3134_v48 = vmul.f32 %v371_v47, %v3128_v46  ;;  %386 = vst.msk [vmem:[%s3663_s7 + $0x10] sm:$0xff] %vm190_vm1, %v3123_v45  ;;  %v3155_v51 = vmul.f32 %v372_v50, %v3149_v49  ;;  %v373_v53 = vld [vmem:[%s3661_s2 + $0x28] sm:$0xff]  ;;  %v3181_v55 = vld [vmem:[%s3662_s4 + $0x30] sm:$0xff] }
   0xd   :  { %2378 = vmatprep.mubr.msk.f32.mxu0 %vm60_vm0, %v2973_v8  ;;  %385 = vst.msk [vmem:[%s3663_s7 + $0x8] sm:$0xff] %vm190_vm1, %v3100_v42  ;;  %v3166_v54 = vmul.f32 %v373_v53, %v3160_v52  ;;  %v374_v56 = vld [vmem:[%s3661_s2 + $0x30] sm:$0xff]  ;;  %v3192_v58 = vld [vmem:[%s3662_s4 + $0x38] sm:$0xff] }
   0xe   :  { %387 = vst.msk [vmem:[%s3663_s7 + $0x18] sm:$0xff] %vm190_vm1, %v3134_v48  ;;  %388 = vst.msk [vmem:[%s3663_s7 + $0x20] sm:$0xff] %vm190_vm1, %v3155_v51  ;;  %v3187_v57 = vmul.f32 %v374_v56, %v3181_v55  ;;  %v375_v59 = vld [vmem:[%s3661_s2 + $0x38] sm:$0xff] }
   0xf   :  { %389 = vst.msk [vmem:[%s3663_s7 + $0x28] sm:$0xff] %vm190_vm1, %v3166_v54  ;;  %v3198_v60 = vmul.f32 %v375_v59, %v3192_v58 }
  0x10   :  { %2379 = vmatmul.mubr.msk.f32.gmra.mrb[2].mxu0 %vm60_vm0, %v2982_v9  ;;  %390 = vst.msk [vmem:[%s3663_s7 + $0x30] sm:$0xff] %vm190_vm1, %v3187_v57 }
  0x11   :  { %2381 = vmatprep.mubr.msk.f32.mxu0 %vm60_vm0, %v2987_v10  ;;  %391 = vst.msk [vmem:[%s3663_s7 + $0x38] sm:$0xff] %vm190_vm1, %v3198_v60 }
  0x14   :  { %2382 = vmatmul.mubr.msk.f32.gmra.mrb[4].mxu0 %vm60_vm0, %v2996_v11 }
  0x15   :  { %2384 = vmatprep.mubr.msk.f32.mxu0 %vm60_vm0, %v3001_v12 }
  0x18   :  { %2385 = vmatmul.mubr.msk.f32.gmra.mrb[6].mxu0 %vm60_vm0, %v3010_v13 }
  0x19   :  { %2431 = vmatprep.mubr.msk.f32.mxu0 %vm190_vm1, %v3089_v39 }
  0xdf   :  { %v2377_v15 = vpop.f32.mrb[0].mxu0 }
  0xe0   :  { %v151_v16 = vpop.f32.mrb[1].mxu0 }
  0xe1   :  { %v2653_v17 = vpack.c.bf16 %v2377_v15, %v151_v16 }
  0xe3   :  { %v2380_v18 = vpop.f32.mrb[2].mxu0  ;;  %2654 = vmatprep.subr.bf16.mxu1 %v2653_v17 }
  0xe4   :  { %v161_v19 = vpop.f32.mrb[3].mxu0  ;;  %2656 = vmatpush3.bf16.msra.mxu1 %v2653_v17 }
  0xe5   :  { %v2657_v20 = vpack.c.bf16 %v2380_v18, %v161_v19 }
  0xe7   :  { %v2383_v21 = vpop.f32.mrb[4].mxu0  ;;  %2658 = vmatprep.subr.bf16.mxu1 %v2657_v20 }
  0xe8   :  { %v171_v22 = vpop.f32.mrb[5].mxu0  ;;  %2660 = vmatpush3.bf16.msra.mxu1 %v2657_v20 }
  0xe9   :  { %v2661_v23 = vpack.c.bf16 %v2383_v21, %v171_v22 }
  0xeb   :  { %v2386_v24 = vpop.f32.mrb[6].mxu0  ;;  %2662 = vmatprep.subr.bf16.mxu1 %v2661_v23 }
  0xec   :  { %v181_v25 = vpop.f32.mrb[7].mxu0  ;;  %2664 = vmatpush3.bf16.msra.mxu1 %v2661_v23 }
  0xed   :  { %v2665_v26 = vpack.c.bf16 %v2386_v24, %v181_v25 }
  0xef   :  { %2666 = vmatprep.subr.bf16.mxu1 %v2665_v26 }
  0xf0   :  { %2668 = vmatpush3.bf16.msra.mxu1 %v2665_v26 }
  0xf1   :  { %2686 = vmatprep.subr.bf16.mxu1 %v3076_v36 }
  0xf3   :  { %2404 = vmatmul.mubr.msk.f32.vlgmr.msra.gmra.mrb[0].mxu1 %vm190_vm1, %v3024_v27 }
  0xf4   :  { %2406 = vmatprep.mubr.msk.f32.mxu1 %vm190_vm1, %v3029_v28  ;;  %2688 = vmatpush3.bf16.msra.mxu1 %v3076_v36 }
  0xf7   :  { %2407 = vmatmul.mubr.msk.f32.gmra.mrb[2].mxu1 %vm190_vm1, %v3038_v29 }
  0xf8   :  { %2409 = vmatprep.mubr.msk.f32.mxu1 %vm190_vm1, %v3043_v30 }
  0xfb   :  { %2410 = vmatmul.mubr.msk.f32.gmra.mrb[4].mxu1 %vm190_vm1, %v3052_v31 }
  0xfc   :  { %2412 = vmatprep.mubr.msk.f32.mxu1 %vm190_vm1, %v3057_v32 }
  0xff   :  { %2413 = vmatmul.mubr.msk.f32.gmra.mrb[6].mxu1 %vm190_vm1, %v3066_v33 }
 0x1c6   :  { %v2405_v61 = vpop.f32.mrb[0].mxu1 }
 0x1c7   :  { %v329_v62 = vmin.f32 %v2405_v61, 0.0  ;;  %v281_v63 = vpop.f32.mrb[1].mxu1  ;;  %vm321_vm2 = vcmp.gt.f32.partialorder %v2405_v61, 0.0 }
 0x1c8   :  { %v328_v0 = vmin.f32 %v281_v63, 0.0  ;;  %vm320_vm3 = vcmp.gt.f32.partialorder %v281_v63, 0.0 }
 0x1c9   :  { %v338_v1 = vmul.f32 1.442695, %v329_v62 }
 0x1ca   :  { %v336_v2 = vmul.f32 1.442695, %v328_v0  ;;  %v2408_v4 = vpop.f32.mrb[2].mxu1 }
 0x1cb   :  { %2813 = vpow2.f32 %v338_v1  ;;  %v331_v15 = vmin.f32 %v2408_v4, 0.0  ;;  %v291_v16 = vpop.f32.mrb[3].mxu1  ;;  %vm323_vm4 = vcmp.gt.f32.partialorder %v2408_v4, 0.0 }
 0x1cc   :  { %2815 = vpow2.f32 %v336_v2  ;;  %v330_v17 = vmin.f32 %v291_v16, 0.0  ;;  %vm322_vm5 = vcmp.gt.f32.partialorder %v291_v16, 0.0 }
 0x1cd   :  { %v342_v18 = vmul.f32 1.442695, %v331_v15 }
 0x1ce   :  { %v340_v19 = vmul.f32 1.442695, %v330_v17  ;;  %v2411_v20 = vpop.f32.mrb[4].mxu1 }
 0x1cf   :  { %2817 = vpow2.f32 %v342_v18  ;;  %v333_v21 = vmin.f32 %v2411_v20, 0.0  ;;  %v301_v22 = vpop.f32.mrb[5].mxu1  ;;  %vm325_vm6 = vcmp.gt.f32.partialorder %v2411_v20, 0.0 }
 0x1d0   :  { %2819 = vpow2.f32 %v340_v19  ;;  %v332_v23 = vmin.f32 %v301_v22, 0.0  ;;  %vm324_vm7 = vcmp.gt.f32.partialorder %v301_v22, 0.0 }
 0x1d1   :  { %v346_v24 = vmul.f32 1.442695, %v333_v21 }
 0x1d2   :  { %v344_v25 = vmul.f32 1.442695, %v332_v23  ;;  %v2414_v26 = vpop.f32.mrb[6].mxu1 }
 0x1d3   :  { %2821 = vpow2.f32 %v346_v24  ;;  %v335_v34 = vmin.f32 %v2414_v26, 0.0  ;;  %v311_v35 = vpop.f32.mrb[7].mxu1  ;;  %vm327_vm8 = vcmp.gt.f32.partialorder %v2414_v26, 0.0 }
 0x1d4   :  { %2823 = vpow2.f32 %v344_v25  ;;  %v334_v38 = vmin.f32 %v311_v35, 0.0  ;;  %vm326_vm9 = vcmp.gt.f32.partialorder %v311_v35, 0.0 }
 0x1d5   :  { %v2814_v41 = vpop.eup %2813  ;;  %v350_v44 = vmul.f32 1.442695, %v335_v34 }
 0x1d6   :  { %v2816_v47 = vpop.eup %2815  ;;  %v2073_v50 = vadd.f32 -1.0, %v2814_v41  ;;  %v348_v53 = vmul.f32 1.442695, %v334_v38 }
 0x1d7   :  { %v2072_v56 = vadd.f32 -1.0, %v2816_v47  ;;  %2825 = vpow2.f32 %v350_v44 }
 0x1d8   :  { %v361_v59 = vsel %vm321_vm2, %v2405_v61, %v2073_v50  ;;  %2827 = vpow2.f32 %v348_v53 }
 0x1d9   :  { %v2818_v62 = vpop.eup %2817  ;;  %v360_v0 = vsel %vm320_vm3, %v281_v63, %v2072_v56 }
 0x1da   :  { %v2820_v1 = vpop.eup %2819  ;;  %v2669_v2 = vpack.c.bf16 %v361_v59, %v360_v0  ;;  %v2075_v15 = vadd.f32 -1.0, %v2818_v62 }
 0x1db   :  { %v2074_v17 = vadd.f32 -1.0, %v2820_v1 }
 0x1dc   :  { %v363_v18 = vsel %vm323_vm4, %v2408_v4, %v2075_v15  ;;  %2670 = vmatprep.subr.bf16.mxu0 %v2669_v2  ;;  %2706 = vmatprep.subr.bf16.mxu1 %v2669_v2 }
 0x1dd   :  { %v2822_v19 = vpop.eup %2821  ;;  %v362_v21 = vsel %vm322_vm5, %v291_v16, %v2074_v17  ;;  %2672 = vmatpush3.bf16.msra.mxu0 %v2669_v2  ;;  %vm1020_vm5 = vcmask 7168  }
 0x1de   :  { %v2824_v23 = vpop.eup %2823  ;;  %v2673_v24 = vpack.c.bf16 %v363_v18, %v362_v21  ;;  %v2077_v25 = vadd.f32 -1.0, %v2822_v19 }
 0x1df   :  { %v2076_v61 = vadd.f32 -1.0, %v2824_v23 }
 0x1e0   :  { %v365_v34 = vsel %vm325_vm6, %v2411_v20, %v2077_v25  ;;  %2674 = vmatprep.subr.bf16.mxu0 %v2673_v24 }
 0x1e1   :  { %v2826_v63 = vpop.eup %2825  ;;  %v364_v38 = vsel %vm324_vm7, %v301_v22, %v2076_v61  ;;  %2676 = vmatpush3.bf16.msra.mxu0 %v2673_v24 }
 0x1e2   :  { %v2828_v41 = vpop.eup %2827  ;;  %v2677_v44 = vpack.c.bf16 %v365_v34, %v364_v38  ;;  %v2079_v4 = vadd.f32 -1.0, %v2826_v63 }
 0x1e3   :  { %v2078_v47 = vadd.f32 -1.0, %v2828_v41 }
 0x1e4   :  { %v367_v50 = vsel %vm327_vm8, %v2414_v26, %v2079_v4  ;;  %2678 = vmatprep.subr.bf16.mxu0 %v2677_v44 }
 0x1e5   :  { %v366_v16 = vsel %vm326_vm9, %v311_v35, %v2078_v47  ;;  %2680 = vmatpush3.bf16.msra.mxu0 %v2677_v44 }
 0x1e6   :  { %v2681_v53 = vpack.c.bf16 %v367_v50, %v366_v16 }
 0x1e8   :  { %2682 = vmatprep.subr.bf16.mxu0 %v2681_v53 }
 0x1e9   :  { %2684 = vmatpush3.bf16.msra.mxu0 %v2681_v53 }
 0x1ec   :  { %2432 = vmatmul.mubr.msk.f32.vlgmr.msra.gmra.mrb[8].mxu0 %vm190_vm1, %v3100_v42 }
 0x1ed   :  { %2434 = vmatprep.mubr.msk.f32.mxu0 %vm190_vm1, %v3123_v45 }
 0x1f0   :  { %2435 = vmatmul.mubr.msk.f32.gmra.mrb[10].mxu0 %vm190_vm1, %v3134_v48 }
 0x1f1   :  { %2437 = vmatprep.mubr.msk.f32.mxu0 %vm190_vm1, %v3155_v51 }
 0x1f4   :  { %2438 = vmatmul.mubr.msk.f32.gmra.mrb[12].mxu0 %vm190_vm1, %v3166_v54 }
 0x1f5   :  { %2440 = vmatprep.mubr.msk.f32.mxu0 %vm190_vm1, %v3187_v57 }
 0x1f8   :  { %2441 = vmatmul.mubr.msk.f32.gmra.mrb[14].mxu0 %vm190_vm1, %v3198_v60 }
 0x1f9   :  { %2475 = vmatprep.mubr.msk.f32.mxu0 %vm190_vm1, %v3017_v14 }
 0x2bf   :  { %v2433_v20 = vpop.f32.mrb[8].mxu0 }
 0x2c0   :  { %v848_v22 = vsub.f32 %v361_v59, %v2433_v20  ;;  %v482_v26 = vpop.f32.mrb[9].mxu0 }
 0x2c1   :  { %v847_v35 = vsub.f32 %v360_v0, %v482_v26  ;;  %2447 = vmatprep.mubr.msk.f32.mxu1 %vm521_vm10, %v482_v26 }
 0x2c2   :  { %v856_v56 = vmul.f32 %v848_v22, %v848_v22  ;;  %2448 = vmatmul.mubr.msk.f32.vlgmr.msra.gmra.mrb[8].mxu1 %vm521_vm10, %v2433_v20 }
 0x2c3   :  { %v855_v62 = vmul.f32 %v847_v35, %v847_v35  ;;  %2708 = vmatpush3.bf16.msra.mxu1 %v2669_v2  ;;  %v2436_v1 = vpop.f32.mrb[10].mxu0 }
 0x2c4   :  { %v864_v15 = vsel %vm521_vm10, %v856_v56, 0.0  ;;  %v850_v17 = vsub.f32 %v363_v18, %v2436_v1  ;;  %2710 = vmatprep.subr.bf16.mxu1 %v2673_v24  ;;  %v492_v19 = vpop.f32.mrb[11].mxu0 }
 0x2c5   :  { %v863_v14 = vsel %vm521_vm10, %v855_v62, 0.0  ;;  %v849_v23 = vsub.f32 %v362_v21, %v492_v19  ;;  %2450 = vmatprep.mubr.msk.f32.mxu1 %vm521_vm10, %v492_v19 }
 0x2c6   :  { %v865_v59 = vadd.f32 %v864_v15, %v863_v14  ;;  %2451 = vmatmul.mubr.msk.f32.gmra.mrb[10].mxu1 %vm521_vm10, %v2436_v1  ;;  %v858_v0 = vmul.f32 %v850_v17, %v850_v17 }
 0x2c7   :  { %v857_v25 = vmul.f32 %v849_v23, %v849_v23  ;;  %2712 = vmatpush3.bf16.msra.mxu1 %v2673_v24  ;;  %v2439_v61 = vpop.f32.mrb[12].mxu0  ;;  %v924_v23 = vld [vmem:[%s3664_s3 + $0x8] sm:$0xff] }
 0x2c8   :  { %v852_v63 = vsub.f32 %v365_v34, %v2439_v61  ;;  %2714 = vmatprep.subr.bf16.mxu1 %v2677_v44  ;;  %v502_v2 = vpop.f32.mrb[13].mxu0  ;;  %v868_v21 = vsel %vm521_vm10, %v858_v0, 0.0 }
 0x2c9   :  { %v866_v41 = vsel %vm521_vm10, %v857_v25, 0.0  ;;  %v851_v18 = vsub.f32 %v364_v38, %v502_v2  ;;  %2453 = vmatprep.mubr.msk.f32.mxu1 %vm521_vm10, %v502_v2 }
 0x2ca   :  { %v867_v4 = vadd.f32 %v866_v41, %v865_v59  ;;  %2454 = vmatmul.mubr.msk.f32.gmra.mrb[12].mxu1 %vm521_vm10, %v2439_v61  ;;  %v860_v47 = vmul.f32 %v852_v63, %v852_v63 }
 0x2cb   :  { %v859_v20 = vmul.f32 %v851_v18, %v851_v18  ;;  %2716 = vmatpush3.bf16.msra.mxu1 %v2677_v44  ;;  %v2442_v22 = vpop.f32.mrb[14].mxu0 }
 0x2cc   :  { %v869_v26 = vadd.f32 %v868_v21, %v867_v4  ;;  %v854_v24 = vsub.f32 %v367_v50, %v2442_v22  ;;  %2718 = vmatprep.subr.bf16.mxu1 %v2681_v53  ;;  %v512_v34 = vpop.f32.mrb[15].mxu0  ;;  %v872_v62 = vsel %vm521_vm10, %v860_v47, 0.0 }
 0x2cd   :  { %v870_v35 = vsel %vm521_vm10, %v859_v20, 0.0  ;;  %v853_v56 = vsub.f32 %v366_v16, %v512_v34  ;;  %2456 = vmatprep.mubr.msk.f32.mxu1 %vm521_vm10, %v512_v34  ;;  %v923_v16 = vld [vmem:[%s3664_s3] sm:$0xff] }
 0x2ce   :  { %v871_v38 = vadd.f32 %v870_v35, %v869_v26  ;;  %2457 = vmatmul.mubr.msk.f32.gmra.mrb[14].mxu1 %vm521_vm10, %v2442_v22  ;;  %v862_v1 = vmul.f32 %v854_v24, %v854_v24 }
 0x2cf   :  { %v861_v15 = vmul.f32 %v853_v56, %v853_v56  ;;  %2720 = vmatpush3.bf16.msra.mxu1 %v2681_v53  ;;  %2503 = vmatprep.mubr.msk.f32.mxu1 %vm190_vm1, %v923_v16 }
 0x2d0   :  { %v873_v17 = vadd.f32 %v872_v62, %v871_v38  ;;  %v876_v50 = vsel %vm521_vm10, %v862_v1, 0.0 }
 0x2d1   :  { %v874_v44 = vsel %vm521_vm10, %v861_v15, 0.0 }
 0x2d2   :  { %v875_v19 = vadd.f32 %v874_v44, %v873_v17  ;;  %2504 = vmatmul.mubr.msk.f32.vlgmr.msra.gmra.mrb[16].mxu1 %vm190_vm1, %v924_v23 }
 0x2d4   :  { %v3242_v14 = vadd.f32 %v876_v50, %v875_v19 }
 0x395   :  { %v2449_v53 = vpop.f32.mrb[8].mxu1 }
 0x396   :  { %v612_v59 = vpop.f32.mrb[9].mxu1 }
 0x397   :  { %v2689_v0 = vpack.c.bf16 %v2449_v53, %v612_v59 }
 0x399   :  { %v2452_v25 = vpop.f32.mrb[10].mxu1  ;;  %2690 = vmatprep.subr.bf16.mxu0 %v2689_v0 }
 0x39a   :  { %v622_v61 = vpop.f32.mrb[11].mxu1  ;;  %2692 = vmatpush3.bf16.msra.mxu0 %v2689_v0 }
 0x39b   :  { %v2693_v63 = vpack.c.bf16 %v2452_v25, %v622_v61 }
 0x39d   :  { %v2455_v2 = vpop.f32.mrb[12].mxu1  ;;  %2694 = vmatprep.subr.bf16.mxu0 %v2693_v63 }
 0x39e   :  { %v632_v41 = vpop.f32.mrb[13].mxu1  ;;  %2696 = vmatpush3.bf16.msra.mxu0 %v2693_v63 }
 0x39f   :  { %v2697_v18 = vpack.c.bf16 %v2455_v2, %v632_v41 }
 0x3a1   :  { %v2458_v4 = vpop.f32.mrb[14].mxu1  ;;  %2698 = vmatprep.subr.bf16.mxu0 %v2697_v18 }
 0x3a2   :  { %v642_v21 = vpop.f32.mrb[15].mxu1  ;;  %2700 = vmatpush3.bf16.msra.mxu0 %v2697_v18 }
 0x3a3   :  { %v2701_v47 = vpack.c.bf16 %v2458_v4, %v642_v21 }
 0x3a5   :  { %2702 = vmatprep.subr.bf16.mxu0 %v2701_v47 }
 0x3a6   :  { %2704 = vmatpush3.bf16.msra.mxu0 %v2701_v47 }
 0x3a7   :  { %2722 = vmatprep.subr.bf16.mxu0 %v2947_v3 }
 0x3a9   :  { %2476 = vmatmul.mubr.msk.f32.vlgmr.msra.gmra.mrb[16].mxu0 %vm190_vm1, %v3024_v27  ;;  %v2115_v27 = vld [vmem:[%s3658_s0 + $0x48] sm:$0xff] }
 0x3aa   :  { %2724 = vmatpush3.bf16.msra.mxu0 %v2947_v3  ;;  %2478 = vmatprep.mubr.msk.f32.mxu0 %vm190_vm1, %v3029_v28  ;;  %v2114_v3 = vld [vmem:[%s3658_s0 + $0x40] sm:$0xff]  ;;  %v2117_v28 = vld [vmem:[%s3658_s0 + $0x58] sm:$0xff] }
 0x3ab   :  { %2726 = vmatprep.subr.bf16.mxu0 %v2957_v6 }
 0x3ad   :  { %2479 = vmatmul.mubr.msk.f32.gmra.mrb[18].mxu0 %vm190_vm1, %v3038_v29  ;;  %v2118_v29 = vld [vmem:[%s3658_s0 + $0x60] sm:$0xff] }
 0x3ae   :  { %2481 = vmatprep.mubr.msk.f32.mxu0 %vm190_vm1, %v3043_v30  ;;  %2728 = vmatpush3.bf16.msra.mxu0 %v2957_v6  ;;  %v2116_v6 = vld [vmem:[%s3658_s0 + $0x50] sm:$0xff]  ;;  %v2119_v30 = vld [vmem:[%s3658_s0 + $0x68] sm:$0xff] }
 0x3b1   :  { %2482 = vmatmul.mubr.msk.f32.gmra.mrb[20].mxu0 %vm190_vm1, %v3052_v31  ;;  %v2120_v31 = vld [vmem:[%s3658_s0 + $0x70] sm:$0xff] }
 0x3b2   :  { %2484 = vmatprep.mubr.msk.f32.mxu0 %vm190_vm1, %v3057_v32  ;;  %v2121_v32 = vld [vmem:[%s3658_s0 + $0x78] sm:$0xff] }
 0x3b5   :  { %2485 = vmatmul.mubr.msk.f32.gmra.mrb[22].mxu0 %vm190_vm1, %v3066_v33  ;;  %v3305_v33 = vld [vmem:[%s3659_s1 + $0x40] sm:$0xff] }
 0x3b6   :  { %2514 = vmatprep.mubr.msk.f32.mxu0 %vm60_vm0, %v2114_v3  ;;  %2542 = vmatprep.mubr.msk.f32.mxu1 %vm190_vm1, %v3305_v33 }
 0x3b9   :  { %2515 = vmatmul.mubr.msk.f32.vlgmr.msra.gmra.mrb[24].mxu0 %vm60_vm0, %v2115_v27 }
 0x3ba   :  { %2517 = vmatprep.mubr.msk.f32.mxu0 %vm60_vm0, %v2116_v6 }
 0x3bd   :  { %2518 = vmatmul.mubr.msk.f32.gmra.mrb[26].mxu0 %vm60_vm0, %v2117_v28 }
 0x3be   :  { %2520 = vmatprep.mubr.msk.f32.mxu0 %vm60_vm0, %v2118_v29 }
 0x3c1   :  { %2521 = vmatmul.mubr.msk.f32.gmra.mrb[28].mxu0 %vm60_vm0, %v2119_v30 }
 0x3c2   :  { %2523 = vmatprep.mubr.msk.f32.mxu0 %vm60_vm0, %v2120_v31 }
 0x3c5   :  { %2524 = vmatmul.mubr.msk.f32.gmra.mrb[30].mxu0 %vm60_vm0, %v2121_v32 }
 0x47c   :  { %v2477_v20 = vpop.f32.mrb[16].mxu0 }
 0x47d   :  { %v765_v22 = vmin.f32 %v2477_v20, 0.0  ;;  %v717_v26 = vpop.f32.mrb[17].mxu0  ;;  %vm757_vm11 = vcmp.gt.f32.partialorder %v2477_v20, 0.0 }
 0x47e   :  { %v764_v24 = vmin.f32 %v717_v26, 0.0  ;;  %vm756_vm12 = vcmp.gt.f32.partialorder %v717_v26, 0.0 }
 0x47f   :  { %v774_v34 = vmul.f32 1.442695, %v765_v22 }
 0x480   :  { %v772_v35 = vmul.f32 1.442695, %v764_v24  ;;  %v2480_v56 = vpop.f32.mrb[18].mxu0 }
 0x481   :  { %2829 = vpow2.f32 %v774_v34  ;;  %v767_v38 = vmin.f32 %v2480_v56, 0.0  ;;  %v727_v62 = vpop.f32.mrb[19].mxu0  ;;  %vm759_vm13 = vcmp.gt.f32.partialorder %v2480_v56, 0.0 }
 0x482   :  { %2831 = vpow2.f32 %v772_v35  ;;  %v766_v1 = vmin.f32 %v727_v62, 0.0  ;;  %vm758_vm14 = vcmp.gt.f32.partialorder %v727_v62, 0.0 }
 0x483   :  { %v778_v15 = vmul.f32 1.442695, %v767_v38 }
 0x484   :  { %v776_v17 = vmul.f32 1.442695, %v766_v1  ;;  %v3309_v44 = vpop.f32.mrb[20].mxu0 }
 0x485   :  { %2833 = vpow2.f32 %v778_v15  ;;  %v769_v19 = vmin.f32 %v3309_v44, 0.0  ;;  %v3312_v50 = vpop.f32.mrb[21].mxu0  ;;  %vm761_vm15 = vcmp.gt.f32.partialorder %v3309_v44, 0.0 }
 0x486   :  { %2835 = vpow2.f32 %v776_v17  ;;  %v768_v16 = vmin.f32 %v3312_v50, 0.0  ;;  %vm760_vm2 = vcmp.gt.f32.partialorder %v3312_v50, 0.0 }
 0x487   :  { %v782_v23 = vmul.f32 1.442695, %v769_v19 }
 0x488   :  { %v780_v53 = vmul.f32 1.442695, %v768_v16  ;;  %v3315_v59 = vpop.f32.mrb[22].mxu0 }
 0x489   :  { %2837 = vpow2.f32 %v782_v23  ;;  %v771_v0 = vmin.f32 %v3315_v59, 0.0  ;;  %v3318_v25 = vpop.f32.mrb[23].mxu0  ;;  %vm763_vm3 = vcmp.gt.f32.partialorder %v3315_v59, 0.0 }
 0x48a   :  { %2839 = vpow2.f32 %v780_v53  ;;  %v770_v61 = vmin.f32 %v3318_v25, 0.0  ;;  %vm762_vm4 = vcmp.gt.f32.partialorder %v3318_v25, 0.0 }
 0x48b   :  { %v2830_v63 = vpop.eup %2829  ;;  %v786_v2 = vmul.f32 1.442695, %v771_v0 }
 0x48c   :  { %v2832_v41 = vpop.eup %2831  ;;  %v2105_v18 = vadd.f32 -1.0, %v2830_v63  ;;  %v784_v4 = vmul.f32 1.442695, %v770_v61  ;;  %v2516_v21 = vpop.f32.mrb[24].mxu0 }
 0x48d   :  { %v2104_v47 = vadd.f32 -1.0, %v2832_v41  ;;  %2841 = vpow2.f32 %v786_v2  ;;  %v1155_v3 = vpop.f32.mrb[25].mxu0 }
 0x48e   :  { %v797_v27 = vsel %vm757_vm11, %v2477_v20, %v2105_v18  ;;  %2843 = vpow2.f32 %v784_v4  ;;  %v2729_v6 = vpack.c.bf16 %v2516_v21, %v1155_v3 }
 0x48f   :  { %v2834_v28 = vpop.eup %2833  ;;  %v805_v29 = vsub.f32 %v2968_v7, %v797_v27  ;;  %v796_v30 = vsel %vm756_vm12, %v717_v26, %v2104_v47 }
 0x490   :  { %v2836_v31 = vpop.eup %2835  ;;  %v804_v32 = vsub.f32 %v2955_v5, %v796_v30  ;;  %v2107_v22 = vadd.f32 -1.0, %v2834_v28  ;;  %v2519_v24 = vpop.f32.mrb[26].mxu0  ;;  %2730 = vmatprep.subr.bf16.mxu1 %v2729_v6 }
 0x491   :  { %v813_v34 = vmul.f32 %v805_v29, %v805_v29  ;;  %v2106_v35 = vadd.f32 -1.0, %v2836_v31  ;;  %v1165_v38 = vpop.f32.mrb[27].mxu0  ;;  %2732 = vmatpush3.bf16.msra.mxu1 %v2729_v6 }
 0x492   :  { %v812_v1 = vmul.f32 %v804_v32, %v804_v32  ;;  %v799_v20 = vsel %vm759_vm13, %v2480_v56, %v2107_v22  ;;  %v2733_v15 = vpack.c.bf16 %v2519_v24, %v1165_v38  ;;  %v3345_v38 = vld [vmem:[%s3659_s1 + $0x48] sm:$0xff] }
 0x493   :  { %v2838_v17 = vpop.eup %2837  ;;  %v821_v19 = vsel %vm60_vm0, %v813_v34, 0.0  ;;  %v807_v7 = vsub.f32 %v2982_v9, %v799_v20  ;;  %v798_v26 = vsel %vm758_vm14, %v727_v62, %v2106_v35 }
 0x494   :  { %v2840_v16 = vpop.eup %2839  ;;  %v820_v5 = vsel %vm60_vm0, %v812_v1, 0.0  ;;  %v806_v23 = vsub.f32 %v2973_v8, %v798_v26  ;;  %v2109_v53 = vadd.f32 -1.0, %v2838_v17  ;;  %v2522_v0 = vpop.f32.mrb[28].mxu0  ;;  %2734 = vmatprep.subr.bf16.mxu1 %v2733_v15  ;;  %v3362_v17 = vld [vmem:[%s3659_s1 + $0x58] sm:$0xff]  ;;  %v3369_v26 = vld [vmem:[%s3659_s1 + $0x60] sm:$0xff] }
 0x495   :  { %v822_v61 = vadd.f32 %v821_v19, %v820_v5  ;;  %v815_v63 = vmul.f32 %v807_v7, %v807_v7  ;;  %v2108_v56 = vadd.f32 -1.0, %v2840_v16  ;;  %v1175_v2 = vpop.f32.mrb[29].mxu0  ;;  %2736 = vmatpush3.bf16.msra.mxu1 %v2733_v15  ;;  %v3378_v5 = vld [vmem:[%s3659_s1 + $0x68] sm:$0xff] }
 0x496   :  { %v814_v41 = vmul.f32 %v806_v23, %v806_v23  ;;  %v801_v18 = vsel %vm761_vm15, %v3309_v44, %v2109_v53  ;;  %v2737_v9 = vpack.c.bf16 %v2522_v0, %v1175_v2  ;;  %v3393_v23 = vld [vmem:[%s3659_s1 + $0x78] sm:$0xff]  ;;  %v2505_v53 = vpop.f32.mrb[16].mxu1 }
 0x497   :  { %v2842_v62 = vpop.eup %2841  ;;  %v809_v4 = vsub.f32 %v2996_v11, %v801_v18  ;;  %v800_v8 = vsel %vm760_vm2, %v3312_v50, %v2108_v56  ;;  %v825_v44 = vsel %vm60_vm0, %v815_v63, 0.0  ;;  %v997_v0 = vpop.f32.mrb[17].mxu1  ;;  %v2155_v56 = vld [vmem:[%s3661_s2 + $0x48] sm:$0xff]  ;;  %v2157_v18 = vld [vmem:[%s3661_s2 + $0x58] sm:$0xff] }
 0x498   :  { %v2844_v21 = vpop.eup %2843  ;;  %v823_v47 = vsel %vm60_vm0, %v814_v41, 0.0  ;;  %v808_v3 = vsub.f32 %v2987_v10, %v800_v8  ;;  %v2111_v27 = vadd.f32 -1.0, %v2842_v62  ;;  %v2525_v6 = vpop.f32.mrb[30].mxu0  ;;  %2738 = vmatprep.subr.bf16.mxu1 %v2737_v9  ;;  %v3408_v41 = vmul.f32 %v2155_v56, %v3094_v40 }
 0x499   :  { %v824_v28 = vadd.f32 %v823_v47, %v822_v61  ;;  %v2110_v29 = vadd.f32 -1.0, %v2844_v21  ;;  %v1185_v30 = vpop.f32.mrb[31].mxu0  ;;  %2740 = vmatpush3.bf16.msra.mxu1 %v2737_v9  ;;  %v817_v11 = vmul.f32 %v809_v4, %v809_v4  ;;  %v1006_v61 = vmul.f32 %v2505_v53, %v997_v0 }
 0x49a   :  { %v816_v50 = vmul.f32 %v808_v3, %v808_v3  ;;  %v803_v31 = vsel %vm763_vm3, %v3315_v59, %v2111_v27  ;;  %v2741_v32 = vpack.c.bf16 %v2525_v6, %v1185_v30  ;;  %v3350_v59 = vld [vmem:[%s3659_s1 + $0x50] sm:$0xff]  ;;  %2163 = vst.msk [vmem:[%s3663_s7 + $0x48] sm:$0xff] %vm190_vm1, %v3408_v41  ;;  %v3432_v9 = vmul.f32 %v2157_v18, %v3128_v46  ;;  %v2159_v46 = vld [vmem:[%s3661_s2 + $0x68] sm:$0xff] }
 0x49b   :  { %v802_v10 = vsel %vm762_vm4, %v3318_v25, %v2110_v29  ;;  %v811_v22 = vsub.f32 %v3010_v13, %v803_v31  ;;  %v826_v24 = vadd.f32 %v825_v44, %v824_v28  ;;  %v829_v20 = vsel %vm60_vm0, %v817_v11, 0.0 }
 0x49c   :  { %v810_v34 = vsub.f32 %v3001_v12, %v802_v10  ;;  %2742 = vmatprep.subr.bf16.mxu1 %v2741_v32  ;;  %v827_v35 = vsel %vm60_vm0, %v816_v50, 0.0  ;;  %v1007_v63 = vsel %vm521_vm10, %v1006_v61, 0.0  ;;  %2165 = vst.msk [vmem:[%s3663_s7 + $0x58] sm:$0xff] %vm190_vm1, %v3432_v9  ;;  %v3454_v4 = vmul.f32 %v2159_v46, %v3160_v52  ;;  %v2161_v52 = vld [vmem:[%s3661_s2 + $0x78] sm:$0xff] }
 0x49d   :  { %2744 = vmatpush3.bf16.msra.mxu1 %v2741_v32  ;;  %v828_v1 = vadd.f32 %v827_v35, %v826_v24  ;;  %v819_v13 = vmul.f32 %v811_v22, %v811_v22  ;;  %1008 = vadd.xlane.f32.xlu0 %v1007_v63  ;;  %v3476_v21 = vmul.f32 %v2161_v52, %v3192_v58 }
 0x49e   :  { %v818_v25 = vmul.f32 %v810_v34, %v810_v34  ;;  %2762 = vmatprep.subr.bf16.mxu1 %v3076_v36  ;;  %2167 = vst.msk [vmem:[%s3663_s7 + $0x68] sm:$0xff] %vm190_vm1, %v3454_v4 }
 0x49f   :  { %v830_v12 = vadd.f32 %v829_v20, %v828_v1  ;;  %v833_v7 = vsel %vm60_vm0, %v819_v13, 0.0  ;;  %2169 = vst.msk [vmem:[%s3663_s7 + $0x78] sm:$0xff] %vm190_vm1, %v3476_v21 }
 0x4a0   :  { %2543 = vmatmul.mubr.msk.f32.vlgmr.msra.gmra.mrb[18].mxu1 %vm190_vm1, %v3345_v38  ;;  %v831_v15 = vsel %vm60_vm0, %v818_v25, 0.0 }
 0x4a1   :  { %2545 = vmatprep.mubr.msk.f32.mxu1 %vm190_vm1, %v3350_v59  ;;  %v832_v19 = vadd.f32 %v831_v15, %v830_v12  ;;  %2764 = vmatpush3.bf16.msra.mxu1 %v3076_v36  ;;  %v3383_v36 = vld [vmem:[%s3659_s1 + $0x70] sm:$0xff] }
 0x4a3   :  { %v834_v16 = vadd.f32 %v833_v7, %v832_v19 }
 0x4a4   :  { %2546 = vmatmul.mubr.msk.f32.gmra.mrb[20].mxu1 %vm190_vm1, %v3362_v17 }
 0x4a5   :  { %835 = vadd.xlane.f32.xlu1 %v834_v16  ;;  %2548 = vmatprep.mubr.msk.f32.mxu1 %vm190_vm1, %v3369_v26 }
 0x4a8   :  { %2549 = vmatmul.mubr.msk.f32.gmra.mrb[22].mxu1 %vm190_vm1, %v3378_v5 }
 0x4a9   :  { %878 = vadd.xlane.f32.xlu1 %v3242_v14  ;;  %2551 = vmatprep.mubr.msk.f32.mxu1 %vm190_vm1, %v3383_v36  ;;  %v2154_v14 = vld [vmem:[%s3661_s2 + $0x40] sm:$0xff] }
 0x4aa   :  { %v3405_v2 = vmul.f32 %v2154_v14, %v3083_v37  ;;  %v2156_v37 = vld [vmem:[%s3661_s2 + $0x50] sm:$0xff] }
 0x4ab   :  { %v3426_v40 = vmul.f32 %v2156_v37, %v3117_v43  ;;  %v2158_v43 = vld [vmem:[%s3661_s2 + $0x60] sm:$0xff] }
 0x4ac   :  { %2552 = vmatmul.mubr.msk.f32.gmra.mrb[24].mxu1 %vm190_vm1, %v3393_v23  ;;  %2162 = vst.msk [vmem:[%s3663_s7 + $0x40] sm:$0xff] %vm190_vm1, %v3405_v2  ;;  %2570 = vmatprep.mubr.msk.f32.mxu0 %vm190_vm1, %v3405_v2  ;;  %v3448_v62 = vmul.f32 %v2158_v43, %v3149_v49  ;;  %v2160_v49 = vld [vmem:[%s3661_s2 + $0x70] sm:$0xff] }
 0x4ad   :  { %2164 = vst.msk [vmem:[%s3663_s7 + $0x50] sm:$0xff] %vm190_vm1, %v3426_v40  ;;  %v3470_v8 = vmul.f32 %v2160_v49, %v3181_v55 }
 0x4ae   :  { %2166 = vst.msk [vmem:[%s3663_s7 + $0x60] sm:$0xff] %vm190_vm1, %v3448_v62 }
 0x4af   :  { %2168 = vst.msk [vmem:[%s3663_s7 + $0x70] sm:$0xff] %vm190_vm1, %v3470_v8 }
 0x52a   :  { %v1009_v10 = vpop.xlane.xlu0 %1008 }
 0x52b   :  { %v1012_v22 = vand.u32 2147483647, %v1009_v10  ;;  %v1010_v25 = vsub.f32 0.0, %v1009_v10 }
 0x52d   :  { %v1013_v24 = vsub.f32 0.0, %v1012_v22  ;;  %v1011_v13 = vmax.f32 %v1010_v25, 0.0 }
 0x52f   :  { %v1014_v34 = vmul.f32 1.442695, %v1013_v24 }
 0x531   :  { %2845 = vpow2.f32 %v1014_v34 }
 0x532   :  { %v836_v55 = vpop.xlane.xlu1 %835 }
 0x533   :  { %v837_v47 = vrot.slane %v836_v55, 4 }
 0x535   :  { %v838_v3 = vadd.f32 %v837_v47, %v836_v55 }
 0x536   :  { %v879_v27 = vpop.xlane.xlu1 %878 }
 0x537   :  { %v839_v6 = vrot.slane %v838_v3, 2  ;;  %v880_v44 = vrot.slane %v879_v27, 4 }
 0x539   :  { %v881_v58 = vadd.f32 %v880_v44, %v879_v27  ;;  %v840_v28 = vadd.f32 %v839_v6, %v838_v3 }
 0x53b   :  { %v882_v29 = vrot.slane %v881_v58, 2  ;;  %v841_v30 = vrot.slane %v840_v28, 1  ;;  %v2846_v35 = vpop.eup %2845 }
 0x53c   :  { %v1016_v1 = vadd.f32 1.0, %v2846_v35 }
 0x53d   :  { %v842_v11 = vadd.f32 %v841_v30, %v840_v28  ;;  %v883_v50 = vadd.f32 %v882_v29, %v881_v58 }
 0x53e   :  { %2847 = vlog2.f32 %v1016_v1 }
 0x53f   :  { %2797 = vpush %v842_v11  ;;  %v884_v31 = vrot.slane %v883_v50, 1 }
 0x541   :  { %v885_v32 = vadd.f32 %v884_v31, %v883_v50 }
 0x543   :  { %2799 = vpush %v885_v32 }
 0x548   :  { %v2848_v20 = vpop.eup %2847 }
 0x549   :  { %v1018_v12 = vmul.f32 0.6931472, %v2848_v20 }
 0x54b   :  { %v1019_v15 = vadd.f32 %v1018_v12, %v1011_v13 }
 0x54d   :  { %v1021_v53 = vsel %vm1020_vm5, %v1019_v15, 0.0 }
 0x54e   :  { %1022 = vadd.xlane.f32.xlu1 %v1021_v53 }
 0x573   :  { %v2544_v19 = vpop.f32.mrb[18].mxu1 }
 0x574   :  { %v1332_v7 = vmin.f32 %v2544_v19, 0.0  ;;  %v1284_v16 = vpop.f32.mrb[19].mxu1  ;;  %vm1324_vm6 = vcmp.gt.f32.partialorder %v2544_v19, 0.0 }
 0x575   :  { %v1331_v0 = vmin.f32 %v1284_v16, 0.0  ;;  %vm1323_vm7 = vcmp.gt.f32.partialorder %v1284_v16, 0.0 }
 0x576   :  { %v1341_v61 = vmul.f32 1.442695, %v1332_v7 }
 0x577   :  { %v1339_v63 = vmul.f32 1.442695, %v1331_v0  ;;  %v2547_v14 = vpop.f32.mrb[20].mxu1 }
 0x578   :  { %2849 = vpow2.f32 %v1341_v61  ;;  %v1334_v56 = vmin.f32 %v2547_v14, 0.0  ;;  %v1294_v37 = vpop.f32.mrb[21].mxu1  ;;  %vm1326_vm8 = vcmp.gt.f32.partialorder %v2547_v14, 0.0 }
 0x579   :  { %2851 = vpow2.f32 %v1339_v63  ;;  %v1333_v18 = vmin.f32 %v1294_v37, 0.0  ;;  %vm1325_vm9 = vcmp.gt.f32.partialorder %v1294_v37, 0.0 }
 0x57a   :  { %v1345_v43 = vmul.f32 1.442695, %v1334_v56 }
 0x57b   :  { %v1343_v46 = vmul.f32 1.442695, %v1333_v18  ;;  %v2550_v49 = vpop.f32.mrb[22].mxu1 }
 0x57c   :  { %2853 = vpow2.f32 %v1345_v43  ;;  %v1336_v52 = vmin.f32 %v2550_v49, 0.0  ;;  %v1304_v55 = vpop.f32.mrb[23].mxu1  ;;  %vm1328_vm11 = vcmp.gt.f32.partialorder %v2550_v49, 0.0 }
 0x57d   :  { %2855 = vpow2.f32 %v1343_v46  ;;  %v1335_v47 = vmin.f32 %v1304_v55, 0.0  ;;  %vm1327_vm12 = vcmp.gt.f32.partialorder %v1304_v55, 0.0 }
 0x57e   :  { %v1349_v3 = vmul.f32 1.442695, %v1336_v52 }
 0x57f   :  { %v1347_v27 = vmul.f32 1.442695, %v1335_v47  ;;  %v2553_v6 = vpop.f32.mrb[24].mxu1 }
 0x580   :  { %2857 = vpow2.f32 %v1349_v3  ;;  %v1338_v44 = vmin.f32 %v2553_v6, 0.0  ;;  %v1314_v58 = vpop.f32.mrb[25].mxu1  ;;  %vm1330_vm13 = vcmp.gt.f32.partialorder %v2553_v6, 0.0 }
 0x581   :  { %2859 = vpow2.f32 %v1347_v27  ;;  %v1337_v28 = vmin.f32 %v1314_v58, 0.0  ;;  %vm1329_vm14 = vcmp.gt.f32.partialorder %v1314_v58, 0.0 }
 0x582   :  { %v2850_v29 = vpop.eup %2849  ;;  %v1353_v30 = vmul.f32 1.442695, %v1338_v44 }
 0x583   :  { %v2852_v11 = vpop.eup %2851  ;;  %v2147_v50 = vadd.f32 -1.0, %v2850_v29  ;;  %v1351_v31 = vmul.f32 1.442695, %v1337_v28 }
 0x584   :  { %v2146_v32 = vadd.f32 -1.0, %v2852_v11  ;;  %2861 = vpow2.f32 %v1353_v30 }
 0x585   :  { %v1364_v10 = vsel %vm1324_vm6, %v2544_v19, %v2147_v50  ;;  %2863 = vpow2.f32 %v1351_v31 }
 0x586   :  { %v2854_v22 = vpop.eup %2853  ;;  %v1363_v24 = vsel %vm1323_vm7, %v1284_v16, %v2146_v32 }
 0x587   :  { %v2856_v34 = vpop.eup %2855  ;;  %v2745_v35 = vpack.c.bf16 %v1364_v10, %v1363_v24  ;;  %v2149_v1 = vadd.f32 -1.0, %v2854_v22 }
 0x588   :  { %v2148_v25 = vadd.f32 -1.0, %v2856_v34 }
 0x589   :  { %v1366_v13 = vsel %vm1326_vm8, %v2547_v14, %v2149_v1  ;;  %2746 = vmatprep.subr.bf16.mxu0 %v2745_v35  ;;  %2782 = vmatprep.subr.bf16.mxu1 %v2745_v35 }
 0x58a   :  { %v2858_v20 = vpop.eup %2857  ;;  %v1365_v12 = vsel %vm1325_vm9, %v1294_v37, %v2148_v25  ;;  %2748 = vmatpush3.bf16.msra.mxu0 %v2745_v35 }
 0x58b   :  { %v2860_v15 = vpop.eup %2859  ;;  %v2749_v7 = vpack.c.bf16 %v1366_v13, %v1365_v12  ;;  %v2151_v53 = vadd.f32 -1.0, %v2858_v20 }
 0x58c   :  { %v2150_v19 = vadd.f32 -1.0, %v2860_v15 }
 0x58d   :  { %v1368_v0 = vsel %vm1328_vm11, %v2550_v49, %v2151_v53  ;;  %2750 = vmatprep.subr.bf16.mxu0 %v2749_v7 }
 0x58e   :  { %v2862_v16 = vpop.eup %2861  ;;  %v1367_v61 = vsel %vm1327_vm12, %v1304_v55, %v2150_v19  ;;  %2752 = vmatpush3.bf16.msra.mxu0 %v2749_v7 }
 0x58f   :  { %v2864_v63 = vpop.eup %2863  ;;  %v2753_v56 = vpack.c.bf16 %v1368_v0, %v1367_v61  ;;  %v2153_v14 = vadd.f32 -1.0, %v2862_v16 }
 0x590   :  { %v2152_v18 = vadd.f32 -1.0, %v2864_v63 }
 0x591   :  { %v1370_v43 = vsel %vm1330_vm13, %v2553_v6, %v2153_v14  ;;  %2754 = vmatprep.subr.bf16.mxu0 %v2753_v56 }
 0x592   :  { %v1369_v37 = vsel %vm1329_vm14, %v1314_v58, %v2152_v18  ;;  %2756 = vmatpush3.bf16.msra.mxu0 %v2753_v56 }
 0x593   :  { %v2757_v46 = vpack.c.bf16 %v1370_v43, %v1369_v37 }
 0x595   :  { %2758 = vmatprep.subr.bf16.mxu0 %v2757_v46 }
 0x596   :  { %2760 = vmatpush3.bf16.msra.mxu0 %v2757_v46 }
 0x599   :  { %2571 = vmatmul.mubr.msk.f32.vlgmr.msra.gmra.mrb[32].mxu0 %vm190_vm1, %v3408_v41 }
 0x59a   :  { %2573 = vmatprep.mubr.msk.f32.mxu0 %vm190_vm1, %v3426_v40 }
 0x59d   :  { %2574 = vmatmul.mubr.msk.f32.gmra.mrb[34].mxu0 %vm190_vm1, %v3432_v9 }
 0x59e   :  { %2576 = vmatprep.mubr.msk.f32.mxu0 %vm190_vm1, %v3448_v62 }
 0x5a1   :  { %2577 = vmatmul.mubr.msk.f32.gmra.mrb[36].mxu0 %vm190_vm1, %v3454_v4 }
 0x5a2   :  { %2579 = vmatprep.mubr.msk.f32.mxu0 %vm190_vm1, %v3470_v8 }
 0x5a5   :  { %2580 = vmatmul.mubr.msk.f32.gmra.mrb[38].mxu0 %vm190_vm1, %v3476_v21 }
 0x5a6   :  { %2614 = vmatprep.mubr.msk.f32.mxu0 %vm190_vm1, %v3305_v33 }
 0x66c   :  { %v2572_v49 = vpop.f32.mrb[32].mxu0 }
 0x66d   :  { %v1852_v52 = vsub.f32 %v1364_v10, %v2572_v49  ;;  %v1487_v55 = vpop.f32.mrb[33].mxu0 }
 0x66e   :  { %v1851_v47 = vsub.f32 %v1363_v24, %v1487_v55  ;;  %2586 = vmatprep.mubr.msk.f32.mxu1 %vm521_vm10, %v1487_v55 }
 0x66f   :  { %v1860_v3 = vmul.f32 %v1852_v52, %v1852_v52  ;;  %2587 = vmatmul.mubr.msk.f32.vlgmr.msra.gmra.mrb[26].mxu1 %vm521_vm10, %v2572_v49  ;;  %v891_v52 = vand.u32 2147483647, %v3089_v39 }
 0x670   :  { %v1859_v27 = vmul.f32 %v1851_v47, %v1851_v47  ;;  %2784 = vmatpush3.bf16.msra.mxu1 %v2745_v35  ;;  %v2575_v6 = vpop.f32.mrb[34].mxu0  ;;  %v893_v47 = vand.u32 2147483647, %v3123_v45 }
 0x671   :  { %v1868_v44 = vsel %vm521_vm10, %v1860_v3, 0.0  ;;  %v1854_v58 = vsub.f32 %v1366_v13, %v2575_v6  ;;  %2786 = vmatprep.subr.bf16.mxu1 %v2749_v7  ;;  %v1497_v28 = vpop.f32.mrb[35].mxu0  ;;  %v899_v55 = vsel %vm190_vm1, %v891_v52, 0.0 }
 0x672   :  { %v1867_v29 = vsel %vm521_vm10, %v1859_v27, 0.0  ;;  %v1853_v33 = vsub.f32 %v1365_v12, %v1497_v28  ;;  %2589 = vmatprep.mubr.msk.f32.mxu1 %vm521_vm10, %v1497_v28 }
 0x673   :  { %v1869_v30 = vadd.f32 %v1868_v44, %v1867_v29  ;;  %2590 = vmatmul.mubr.msk.f32.gmra.mrb[28].mxu1 %vm521_vm10, %v2575_v6  ;;  %v1862_v11 = vmul.f32 %v1854_v58, %v1854_v58  ;;  %v894_v6 = vand.u32 2147483647, %v3134_v48  ;;  %v902_v44 = vsel %vm190_vm1, %v893_v47, 0.0 }
 0x674   :  { %v1861_v50 = vmul.f32 %v1853_v33, %v1853_v33  ;;  %2788 = vmatpush3.bf16.msra.mxu1 %v2749_v7  ;;  %v2578_v31 = vpop.f32.mrb[36].mxu0  ;;  %v2202_v7 = vld [vmem:[%s3664_s3 + $0x10] sm:$0xff] }
 0x675   :  { %v1856_v32 = vsub.f32 %v1368_v0, %v2578_v31  ;;  %2790 = vmatprep.subr.bf16.mxu1 %v2753_v56  ;;  %v1507_v10 = vpop.f32.mrb[37].mxu0  ;;  %v1872_v35 = vsel %vm521_vm10, %v1862_v11, 0.0  ;;  %v904_v39 = vsel %vm190_vm1, %v894_v6, 0.0 }
 0x676   :  { %v1870_v22 = vsel %vm521_vm10, %v1861_v50, 0.0  ;;  %v1855_v24 = vsub.f32 %v1367_v61, %v1507_v10  ;;  %2592 = vmatprep.mubr.msk.f32.mxu1 %vm521_vm10, %v1507_v10 }
 0x677   :  { %v1871_v34 = vadd.f32 %v1870_v22, %v1869_v30  ;;  %2593 = vmatmul.mubr.msk.f32.gmra.mrb[30].mxu1 %vm521_vm10, %v2578_v31  ;;  %v1864_v1 = vmul.f32 %v1856_v32, %v1856_v32  ;;  %v895_v30 = vand.u32 2147483647, %v3155_v51  ;;  %v896_v31 = vand.u32 2147483647, %v3166_v54 }
 0x678   :  { %v1863_v25 = vmul.f32 %v1855_v24, %v1855_v24  ;;  %2792 = vmatpush3.bf16.msra.mxu1 %v2753_v56  ;;  %v2581_v13 = vpop.f32.mrb[38].mxu0  ;;  %v2203_v56 = vld [vmem:[%s3664_s3 + $0x18] sm:$0xff]  ;;  %v897_v51 = vand.u32 2147483647, %v3187_v57  ;;  %v898_v54 = vand.u32 2147483647, %v3198_v60  ;;  %s2798_s3 = spop %2797 }
 0x679   :  { %v1873_v20 = vadd.f32 %v1872_v35, %v1871_v34  ;;  %v1858_v12 = vsub.f32 %v1370_v43, %v2581_v13  ;;  %2794 = vmatprep.subr.bf16.mxu1 %v2757_v46  ;;  %v1517_v15 = vpop.f32.mrb[39].mxu0  ;;  %v1876_v16 = vsel %vm521_vm10, %v1864_v1, 0.0  ;;  %v906_v48 = vsel %vm190_vm1, %v895_v30, 0.0  ;;  %s2800_s18 = spop %2799  ;;  %s846_s21 = smul.f32 0.00048828125, %s2798_s3 }
 0x67a   :  { %v1874_v53 = vsel %vm521_vm10, %v1863_v25, 0.0  ;;  %v1857_v19 = vsub.f32 %v1369_v37, %v1517_v15  ;;  %2595 = vmatprep.mubr.msk.f32.mxu1 %vm521_vm10, %v1517_v15  ;;  %v908_v34 = vsel %vm190_vm1, %v896_v31, 0.0  ;;  %v912_v57 = vsel %vm190_vm1, %v898_v54, 0.0  ;;  %s889_s19 = smul.f32 0.0009765625, %s2800_s18 }
 0x67b   :  { %v1875_v0 = vadd.f32 %v1874_v53, %v1873_v20  ;;  %2596 = vmatmul.mubr.msk.f32.gmra.mrb[32].mxu1 %vm521_vm10, %v2581_v13  ;;  %v1866_v61 = vmul.f32 %v1858_v12, %v1858_v12  ;;  %v910_v20 = vsel %vm190_vm1, %v897_v51, 0.0  ;;  %v1032_v30 = vstv %s846_s21 }
 0x67c   :  { %v1865_v63 = vmul.f32 %v1857_v19, %v1857_v19  ;;  %2796 = vmatpush3.bf16.msra.mxu1 %v2757_v46  ;;  %2642 = vmatprep.mubr.msk.f32.mxu1 %vm190_vm1, %v2202_v7  ;;  %v892_v46 = vand.u32 2147483647, %v3100_v42  ;;  %s890_s20 = smul.f32 0.5, %s889_s19 }
 0x67d   :  { %v1877_v14 = vadd.f32 %v1876_v16, %v1875_v0  ;;  %v1880_v37 = vsel %vm521_vm10, %v1866_v61, 0.0 }
 0x67e   :  { %v1878_v18 = vsel %vm521_vm10, %v1865_v63, 0.0  ;;  %v900_v3 = vsel %vm190_vm1, %v892_v46, 0.0 }
 0x67f   :  { %2643 = vmatmul.mubr.msk.f32.vlgmr.msra.gmra.mrb[34].mxu1 %vm190_vm1, %v2203_v56  ;;  %v1879_v43 = vadd.f32 %v1878_v18, %v1877_v14  ;;  %v901_v27 = vadd.f32 %v900_v3, %v899_v55 }
 0x681   :  { %v1881_v49 = vadd.f32 %v1880_v37, %v1879_v43  ;;  %v903_v29 = vadd.f32 %v902_v44, %v901_v27 }
 0x683   :  { %1882 = vadd.xlane.f32.xlu1 %v1881_v49  ;;  %v905_v45 = vadd.f32 %v904_v39, %v903_v29 }
 0x685   :  { %v907_v22 = vadd.f32 %v906_v48, %v905_v45 }
 0x687   :  { %v909_v25 = vadd.f32 %v908_v34, %v907_v22 }
 0x689   :  { %v911_v7 = vadd.f32 %v910_v20, %v909_v25 }
 0x68b   :  { %v913_v60 = vadd.f32 %v912_v57, %v911_v7  ;;  %v1896_v7 = vand.u32 2147483647, %v3408_v41 }
 0x742   :  { %v2588_v58 = vpop.f32.mrb[26].mxu1 }
 0x743   :  { %v1616_v28 = vpop.f32.mrb[27].mxu1 }
 0x744   :  { %v2765_v33 = vpack.c.bf16 %v2588_v58, %v1616_v28  ;;  %v42_v28 = vlaneseq }
 0x746   :  { %v2591_v42 = vpop.f32.mrb[28].mxu1  ;;  %2766 = vmatprep.subr.bf16.mxu0 %v2765_v33  ;;  %v3561_v29 = vand.u32 127, %v42_v28  ;;  %v1899_v28 = vand.u32 2147483647, %v3448_v62 }
 0x747   :  { %v1626_v11 = vpop.f32.mrb[29].mxu1  ;;  %2768 = vmatpush3.bf16.msra.mxu0 %v2765_v33  ;;  %v1035_v33 = vstv %s890_s20 }
 0x748   :  { %v2769_v50 = vpack.c.bf16 %v2591_v42, %v1626_v11  ;;  %vm1031_vm15 = vcmp.eq.s32.totalorder %v3561_v29, 0  ;;  %vm1038_vm2 = vcmp.eq.s32.totalorder %v3561_v29, 2  ;;  %vm1042_vm3 = vcmp.eq.s32.totalorder %v3561_v29, 3 }
 0x749   :  { %v1033_v42 = vsel %vm1031_vm15, %v1032_v30, 0.0 }
 0x74a   :  { %v2594_v32 = vpop.f32.mrb[30].mxu1  ;;  %2770 = vmatprep.subr.bf16.mxu0 %v2769_v50 }
 0x74b   :  { %v1636_v10 = vpop.f32.mrb[31].mxu1  ;;  %2772 = vmatpush3.bf16.msra.mxu0 %v2769_v50 }
 0x74c   :  { %v2773_v24 = vpack.c.bf16 %v2594_v32, %v1636_v10 }
 0x74e   :  { %v2597_v35 = vpop.f32.mrb[32].mxu1  ;;  %2774 = vmatprep.subr.bf16.mxu0 %v2773_v24 }
 0x74f   :  { %v1646_v1 = vpop.f32.mrb[33].mxu1  ;;  %2776 = vmatpush3.bf16.msra.mxu0 %v2773_v24 }
 0x750   :  { %v2777_v13 = vpack.c.bf16 %v2597_v35, %v1646_v1 }
 0x752   :  { %2778 = vmatprep.subr.bf16.mxu0 %v2777_v13  ;;  %v2644_v12 = vpop.f32.mrb[34].mxu1 }
 0x753   :  { %2780 = vmatpush3.bf16.msra.mxu0 %v2777_v13  ;;  %v2002_v15 = vpop.f32.mrb[35].mxu1 }
 0x754   :  { %v2011_v53 = vmul.f32 %v2644_v12, %v2002_v15  ;;  %v1895_v12 = vand.u32 2147483647, %v3405_v2  ;;  %v1904_v2 = vsel %vm190_vm1, %v1896_v7, 0.0 }
 0x756   :  { %2615 = vmatmul.mubr.msk.f32.vlgmr.msra.gmra.mrb[40].mxu0 %vm190_vm1, %v3345_v38  ;;  %v2012_v19 = vsel %vm521_vm10, %v2011_v53, 0.0  ;;  %v1023_v38 = vpop.xlane.xlu1 %1022  ;;  %vm1034_vm10 = vcmp.eq.s32.totalorder %v3561_v29, 1 }
 0x757   :  { %2013 = vadd.xlane.f32.xlu0 %v2012_v19  ;;  %2617 = vmatprep.mubr.msk.f32.mxu0 %vm190_vm1, %v3350_v59  ;;  %v1024_v0 = vrot.slane %v1023_v38, 4  ;;  %v1036_v39 = vsel %vm1034_vm10, %v1035_v33, 0.0 }
 0x758   :  { %v1037_v11 = vadd.f32 %v1036_v39, %v1033_v42 }
 0x759   :  { %v1025_v59 = vadd.f32 %v1024_v0, %v1023_v38  ;;  %v1903_v0 = vsel %vm190_vm1, %v1895_v12, 0.0  ;;  %v2889_v12 = vld [vmem:[%s3658_s0 + $0x68] sm:$0xff] }
 0x75a   :  { %2618 = vmatmul.mubr.msk.f32.gmra.mrb[42].mxu0 %vm190_vm1, %v3362_v17 }
 0x75b   :  { %914 = vadd.xlane.f32.xlu0 %v913_v60  ;;  %2620 = vmatprep.mubr.msk.f32.mxu0 %vm190_vm1, %v3369_v26  ;;  %v1026_v17 = vrot.slane %v1025_v59, 2 }
 0x75d   :  { %v1027_v43 = vadd.f32 %v1026_v17, %v1025_v59  ;;  %v1897_v59 = vand.u32 2147483647, %v3426_v40 }
 0x75e   :  { %2621 = vmatmul.mubr.msk.f32.gmra.mrb[44].mxu0 %vm190_vm1, %v3378_v5 }
 0x75f   :  { %2623 = vmatprep.mubr.msk.f32.mxu0 %vm190_vm1, %v3383_v36  ;;  %v1028_v49 = vrot.slane %v1027_v43, 1  ;;  %v1906_v40 = vsel %vm190_vm1, %v1897_v59, 0.0 }
 0x761   :  { %v1029_v46 = vadd.f32 %v1028_v49, %v1027_v43 }
 0x762   :  { %2624 = vmatmul.mubr.msk.f32.gmra.mrb[46].mxu0 %vm190_vm1, %v3393_v23 }
 0x7e4   :  { %v2014_v16 = vpop.xlane.xlu0 %2013 }
 0x7e5   :  { %v2017_v61 = vand.u32 2147483647, %v2014_v16  ;;  %v2015_v47 = vsub.f32 0.0, %v2014_v16 }
 0x7e7   :  { %v2018_v63 = vsub.f32 0.0, %v2017_v61  ;;  %v2016_v3 = vmax.f32 %v2015_v47, 0.0 }
 0x7e8   :  { %v915_v56 = vpop.xlane.xlu0 %914 }
 0x7e9   :  { %v2019_v14 = vmul.f32 1.442695, %v2018_v63  ;;  %v916_v18 = vrot.slane %v915_v56, 4 }
 0x7eb   :  { %2865 = vpow2.f32 %v2019_v14  ;;  %v917_v26 = vadd.f32 %v916_v18, %v915_v56  ;;  %v1905_v14 = vadd.f32 %v1904_v2, %v1903_v0 }
 0x7ed   :  { %v918_v5 = vrot.slane %v917_v26, 2 }
 0x7ef   :  { %v919_v37 = vadd.f32 %v918_v5, %v917_v26  ;;  %v1898_v26 = vand.u32 2147483647, %v3432_v9 }
 0x7f1   :  { %v920_v36 = vrot.slane %v919_v37, 1 }
 0x7f3   :  { %v921_v52 = vadd.f32 %v920_v36, %v919_v37 }
 0x7f5   :  { %v2866_v23 = vpop.eup %2865  ;;  %2801 = vpush %v921_v52 }
 0x7f6   :  { %v2021_v55 = vadd.f32 1.0, %v2866_v23  ;;  %2803 = vpush %v1029_v46  ;;  %v1907_v46 = vadd.f32 %v1906_v40, %v1905_v14 }
 0x7f8   :  { %2867 = vlog2.f32 %v2021_v55  ;;  %v2885_v55 = vld [vmem:[%s3658_s0 + $0x48] sm:$0xff] }
 0x802   :  { %v2868_v27 = vpop.eup %2867 }
 0x803   :  { %v2023_v6 = vmul.f32 0.6931472, %v2868_v27 }
 0x805   :  { %v2024_v44 = vadd.f32 %v2023_v6, %v2016_v3  ;;  %v1908_v3 = vsel %vm190_vm1, %v1898_v26, 0.0  ;;  %v2886_v6 = vld [vmem:[%s3658_s0 + $0x40] sm:$0xff] }
 0x807   :  { %v2025_v58 = vsel %vm1020_vm5, %v2024_v44, 0.0 }
 0x808   :  { %2026 = vadd.xlane.f32.xlu1 %v2025_v58 }
 0x826   :  { %s2802_s22 = spop %2801 }
 0x827   :  { %v1039_v45 = vstv %s2802_s22  ;;  %s2804_s23 = spop %2803 }
 0x828   :  { %v1040_v50 = vsel %vm1038_vm2, %v1039_v45, 0.0  ;;  %v1043_v31 = vstv %s2804_s23 }
 0x829   :  { %v1041_v48 = vadd.f32 %v1040_v50, %v1037_v11  ;;  %v2616_v32 = vpop.f32.mrb[40].mxu0  ;;  %v1044_v10 = vsel %vm1042_vm3, %v1043_v31, 0.0  ;;  %v1909_v11 = vadd.f32 %v1908_v3, %v1907_v46  ;;  %v2887_v31 = vld [vmem:[%s3658_s0 + $0x58] sm:$0xff] }
 0x82a   :  { %v1769_v22 = vmin.f32 %v2616_v32, 0.0  ;;  %v1721_v24 = vpop.f32.mrb[41].mxu0  ;;  %vm1761_vm4 = vcmp.gt.f32.partialorder %v2616_v32, 0.0 }
 0x82b   :  { %v1045_v51 = vadd.f32 %v1044_v10, %v1041_v48  ;;  %v1768_v34 = vmin.f32 %v1721_v24, 0.0  ;;  %vm1760_vm5 = vcmp.gt.f32.partialorder %v1721_v24, 0.0  ;;  %v1900_v10 = vand.u32 2147483647, %v3454_v4 }
 0x82c   :  { %v1778_v35 = vmul.f32 1.442695, %v1769_v22 }
 0x82d   :  { %1046 = vst [vmem:[%s3665_s8] sm:$0x1] %v1045_v51  ;;  %v1776_v1 = vmul.f32 1.442695, %v1768_v34  ;;  %v2619_v25 = vpop.f32.mrb[42].mxu0  ;;  %v1912_v2 = vsel %vm190_vm1, %v1900_v10, 0.0 }
 0x82e   :  { %2869 = vpow2.f32 %v1778_v35  ;;  %v1771_v13 = vmin.f32 %v2619_v25, 0.0  ;;  %v1731_v54 = vpop.f32.mrb[43].mxu0  ;;  %vm1763_vm6 = vcmp.gt.f32.partialorder %v2619_v25, 0.0  ;;  %v1910_v35 = vsel %vm190_vm1, %v1899_v28, 0.0 }
 0x82f   :  { %2871 = vpow2.f32 %v1776_v1  ;;  %v1770_v20 = vmin.f32 %v1731_v54, 0.0  ;;  %vm1762_vm7 = vcmp.gt.f32.partialorder %v1731_v54, 0.0 }
 0x830   :  { %v1782_v15 = vmul.f32 1.442695, %v1771_v13 }
 0x831   :  { %v1780_v53 = vmul.f32 1.442695, %v1770_v20  ;;  %v3580_v57 = vpop.f32.mrb[44].mxu0 }
 0x832   :  { %2873 = vpow2.f32 %v1782_v15  ;;  %v1773_v19 = vmin.f32 %v3580_v57, 0.0  ;;  %v3583_v60 = vpop.f32.mrb[45].mxu0  ;;  %vm1765_vm8 = vcmp.gt.f32.partialorder %v3580_v57, 0.0 }
 0x833   :  { %2875 = vpow2.f32 %v1780_v53  ;;  %v1772_v38 = vmin.f32 %v3583_v60, 0.0  ;;  %vm1764_vm9 = vcmp.gt.f32.partialorder %v3583_v60, 0.0  ;;  %v1901_v53 = vand.u32 2147483647, %v3470_v8 }
 0x834   :  { %v1786_v16 = vmul.f32 1.442695, %v1773_v19  ;;  %v1911_v19 = vadd.f32 %v1910_v35, %v1909_v11 }
 0x835   :  { %v1784_v61 = vmul.f32 1.442695, %v1772_v38  ;;  %v3589_v41 = vpop.f32.mrb[46].mxu0 }
 0x836   :  { %2877 = vpow2.f32 %v1786_v16  ;;  %v1775_v63 = vmin.f32 %v3589_v41, 0.0  ;;  %v3592_v17 = vpop.f32.mrb[47].mxu0  ;;  %vm1767_vm11 = vcmp.gt.f32.partialorder %v3589_v41, 0.0  ;;  %v1913_v46 = vadd.f32 %v1912_v2, %v1911_v19 }
 0x837   :  { %2879 = vpow2.f32 %v1784_v61  ;;  %v1774_v56 = vmin.f32 %v3592_v17, 0.0  ;;  %vm1766_vm12 = vcmp.gt.f32.partialorder %v3592_v17, 0.0 }
 0x838   :  { %v2870_v18 = vpop.eup %2869  ;;  %v1790_v43 = vmul.f32 1.442695, %v1775_v63 }
 0x839   :  { %v2872_v5 = vpop.eup %2871  ;;  %v2195_v37 = vadd.f32 -1.0, %v2870_v18  ;;  %v1788_v49 = vmul.f32 1.442695, %v1774_v56  ;;  %v2891_v18 = vld [vmem:[%s3658_s0 + $0x78] sm:$0xff] }
 0x83a   :  { %v2194_v36 = vadd.f32 -1.0, %v2872_v5  ;;  %2881 = vpow2.f32 %v1790_v43 }
 0x83b   :  { %v1801_v52 = vsel %vm1761_vm4, %v2616_v32, %v2195_v37  ;;  %2883 = vpow2.f32 %v1788_v49  ;;  %v2892_v37 = vld [vmem:[%s3658_s0 + $0x70] sm:$0xff] }
 0x83c   :  { %v2874_v23 = vpop.eup %2873  ;;  %v1809_v47 = vsub.f32 %v2885_v55, %v1801_v52  ;;  %v1800_v9 = vsel %vm1760_vm5, %v1721_v24, %v2194_v36  ;;  %v2888_v24 = vld [vmem:[%s3658_s0 + $0x50] sm:$0xff]  ;;  %v1902_v52 = vand.u32 2147483647, %v3476_v21  ;;  %v1883_v21 = vpop.xlane.xlu1 %1882 }
 0x83d   :  { %v2876_v27 = vpop.eup %2875  ;;  %v1808_v44 = vsub.f32 %v2886_v6, %v1800_v9  ;;  %v2197_v58 = vadd.f32 -1.0, %v2874_v23 }
 0x83e   :  { %v1817_v33 = vmul.f32 %v1809_v47, %v1809_v47  ;;  %v2196_v30 = vadd.f32 -1.0, %v2876_v27  ;;  %v1914_v47 = vsel %vm190_vm1, %v1901_v53, 0.0 }
 0x83f   :  { %v1816_v39 = vmul.f32 %v1808_v44, %v1808_v44  ;;  %v1803_v42 = vsel %vm1763_vm6, %v2619_v25, %v2197_v58  ;;  %v1915_v27 = vadd.f32 %v1914_v47, %v1913_v46  ;;  %v1916_v44 = vsel %vm190_vm1, %v1902_v52, 0.0 }
 0x840   :  { %v2878_v45 = vpop.eup %2877  ;;  %v1825_v50 = vsel %vm60_vm0, %v1817_v33, 0.0  ;;  %v1811_v48 = vsub.f32 %v2887_v31, %v1803_v42  ;;  %v1802_v32 = vsel %vm1762_vm7, %v1731_v54, %v2196_v30  ;;  %v1884_v33 = vrot.slane %v1883_v21, 4 }
 0x841   :  { %v2880_v22 = vpop.eup %2879  ;;  %v1824_v62 = vsel %vm60_vm0, %v1816_v39, 0.0  ;;  %v1810_v51 = vsub.f32 %v2888_v24, %v1802_v32  ;;  %v2199_v34 = vadd.f32 -1.0, %v2878_v45  ;;  %v1917_v28 = vadd.f32 %v1916_v44, %v1915_v27 }
 0x842   :  { %v1826_v1 = vadd.f32 %v1825_v50, %v1824_v62  ;;  %v2198_v25 = vadd.f32 -1.0, %v2880_v22  ;;  %v1819_v13 = vmul.f32 %v1811_v48, %v1811_v48  ;;  %v1885_v39 = vadd.f32 %v1884_v33, %v1883_v21 }
 0x843   :  { %v1818_v20 = vmul.f32 %v1810_v51, %v1810_v51  ;;  %v1805_v54 = vsel %vm1765_vm8, %v3580_v57, %v2199_v34  ;;  %v2890_v57 = vld [vmem:[%s3658_s0 + $0x60] sm:$0xff] }
 0x844   :  { %v2882_v4 = vpop.eup %2881  ;;  %v1813_v15 = vsub.f32 %v2889_v12, %v1805_v54  ;;  %v1804_v7 = vsel %vm1764_vm9, %v3583_v60, %v2198_v25  ;;  %v1829_v8 = vsel %vm60_vm0, %v1819_v13, 0.0  ;;  %v1886_v11 = vrot.slane %v1885_v39, 2 }
 0x845   :  { %v2884_v38 = vpop.eup %2883  ;;  %v1827_v0 = vsel %vm60_vm0, %v1818_v20, 0.0  ;;  %v1812_v59 = vsub.f32 %v2890_v57, %v1804_v7  ;;  %v2201_v16 = vadd.f32 -1.0, %v2882_v4 }
 0x846   :  { %v1828_v61 = vadd.f32 %v1827_v0, %v1826_v1  ;;  %v2200_v60 = vadd.f32 -1.0, %v2884_v38  ;;  %v1821_v63 = vmul.f32 %v1813_v15, %v1813_v15  ;;  %v1887_v22 = vadd.f32 %v1886_v11, %v1885_v39 }
 0x847   :  { %v1820_v56 = vmul.f32 %v1812_v59, %v1812_v59  ;;  %v1807_v14 = vsel %vm1767_vm11, %v3589_v41, %v2201_v16 }
 0x848   :  { %v1815_v26 = vsub.f32 %v2891_v18, %v1807_v14  ;;  %v1806_v43 = vsel %vm1766_vm12, %v3592_v17, %v2200_v60  ;;  %v1830_v40 = vadd.f32 %v1829_v8, %v1828_v61  ;;  %v1833_v55 = vsel %vm60_vm0, %v1821_v63, 0.0 }
 0x849   :  { %v1831_v5 = vsel %vm60_vm0, %v1820_v56, 0.0  ;;  %v1814_v49 = vsub.f32 %v2892_v37, %v1806_v43  ;;  %v1888_v1 = vrot.slane %v1887_v22, 1 }
 0x84a   :  { %v1832_v36 = vadd.f32 %v1831_v5, %v1830_v40  ;;  %v1823_v23 = vmul.f32 %v1815_v26, %v1815_v26 }
 0x84b   :  { %v1822_v41 = vmul.f32 %v1814_v49, %v1814_v49  ;;  %v1889_v4 = vadd.f32 %v1888_v1, %v1887_v22 }
 0x84c   :  { %v1834_v9 = vadd.f32 %v1833_v55, %v1832_v36  ;;  %v1837_v6 = vsel %vm60_vm0, %v1823_v23, 0.0 }
 0x84d   :  { %v1835_v17 = vsel %vm60_vm0, %v1822_v41, 0.0 }
 0x84e   :  { %v1836_v3 = vadd.f32 %v1835_v17, %v1834_v9 }
 0x850   :  { %v1838_v58 = vadd.f32 %v1837_v6, %v1836_v3 }
 0x852   :  { %1839 = vadd.xlane.f32.xlu0 %v1838_v58 }
 0x856   :  { %1918 = vadd.xlane.f32.xlu0 %v1917_v28 }
 0x895   :  { %v2027_v30 = vpop.xlane.xlu1 %2026 }
 0x896   :  { %v2028_v42 = vrot.slane %v2027_v30, 4 }
 0x898   :  { %v2029_v45 = vadd.f32 %v2028_v42, %v2027_v30 }
 0x89a   :  { %v2030_v32 = vrot.slane %v2029_v45, 2 }
 0x89c   :  { %v2031_v35 = vadd.f32 %v2030_v32, %v2029_v45 }
 0x89e   :  { %v2032_v12 = vrot.slane %v2031_v35, 1 }
 0x8a0   :  { %v2033_v53 = vadd.f32 %v2032_v12, %v2031_v35 }
 0x8df   :  { %v1840_v50 = vpop.xlane.xlu0 %1839 }
 0x8e0   :  { %v1841_v31 = vrot.slane %v1840_v50, 4 }
 0x8e2   :  { %v1842_v48 = vadd.f32 %v1841_v31, %v1840_v50 }
 0x8e3   :  { %v1919_v10 = vpop.xlane.xlu0 %1918 }
 0x8e4   :  { %v1843_v62 = vrot.slane %v1842_v48, 2  ;;  %v1920_v24 = vrot.slane %v1919_v10, 4 }
 0x8e6   :  { %v1921_v51 = vadd.f32 %v1920_v24, %v1919_v10  ;;  %v1844_v34 = vadd.f32 %v1843_v62, %v1842_v48 }
 0x8e8   :  { %v1922_v25 = vrot.slane %v1921_v51, 2  ;;  %v1845_v13 = vrot.slane %v1844_v34, 1 }
 0x8ea   :  { %v1923_v20 = vadd.f32 %v1922_v25, %v1921_v51  ;;  %v1846_v54 = vadd.f32 %v1845_v13, %v1844_v34 }
 0x8ec   :  { %2805 = vpush %v1846_v54  ;;  %v1924_v15 = vrot.slane %v1923_v20, 1 }
 0x8ed   :  { %2807 = vpush %v1889_v4 }
 0x8ee   :  { %v1925_v7 = vadd.f32 %v1924_v15, %v1923_v20 }
 0x8f0   :  { %2809 = vpush %v1925_v7 }
 0x8f1   :  { %2811 = vpush %v2033_v53 }
 0x91d   :  { %s2806_s0 = spop %2805 }
 0x91e   :  { %s1850_s2 = smul.f32 0.00048828125, %s2806_s0  ;;  %s2808_s7 = spop %2807 }
 0x91f   :  { %s1893_s16 = smul.f32 0.0009765625, %s2808_s7 }
 0x920   :  { %v2035_v19 = vstv %s1850_s2 }
 0x921   :  { %s1894_s17 = smul.f32 0.5, %s1893_s16  ;;  %s2810_s3 = spop %2809  ;;  %v2036_v57 = vsel %vm1031_vm15, %v2035_v19, 0.0 }
 0x922   :  { %s2812_s18 = spop %2811  ;;  %v2040_v0 = vstv %s2810_s3 }
 0x923   :  { %v2037_v38 = vstv %s1894_s17  ;;  %v2043_v2 = vstv %s2812_s18  ;;  %v2041_v61 = vsel %vm1038_vm2, %v2040_v0, 0.0 }
 0x924   :  { %v2038_v59 = vsel %vm1034_vm10, %v2037_v38, 0.0  ;;  %v2044_v8 = vsel %vm1042_vm3, %v2043_v2, 0.0 }
 0x925   :  { %v2039_v16 = vadd.f32 %v2038_v59, %v2036_v57 }
 0x927   :  { %v2042_v60 = vadd.f32 %v2041_v61, %v2039_v16 }
 0x929   :  { %v2045_v63 = vadd.f32 %v2044_v8, %v2042_v60 }
 0x92b   :  { %2206 = vst [vmem:[%s3665_s8 + $0x1] sm:$0x1] %v2045_v63 }

</bundles_post_ra>
